<compile_context>
chip_gen: v6e
topology: v6e:2x2x1
jax: 0.10.0
libtpu: 0.0.40
codegen_flags: <defaults>
</compile_context>

<pallas_src>
import jax
import jax.numpy as jnp
from jax.experimental import pallas as pl
from jax.experimental.pallas import tpu as pltpu

# ----------------- small BERT-like config (synthetic weights) -----------------
VOCAB = 128
HIDDEN = 128            # bert hidden_size (small stand-in for 768)
N_LAYERS = 2
N_HEADS = 2
HEAD_DIM = HIDDEN // N_HEADS
HPAD = 128              # per-head lane-group padding (HEAD_DIM -> full 128 lanes)
INTERMEDIATE = 256
MAX_POS = 64
FC1_DIM = 512           # nn.Linear(hidden, 512)
N_CLASSES = 2
LOGIT_PAD = 128         # lane-dense logits block; real classes sliced in wrapper
LN_EPS = 1e-12
ATTN_SCALE = 1.0 / float(HEAD_DIM) ** 0.5

BATCH = 2
SEQ = 8

# Order of stacked per-layer weight arrays as passed to the encoder kernel.
_W_ORDER = ("wq", "bq", "wk", "bk", "wv", "bv",
            "wo", "bo", "ln1_g", "ln1_b",
            "wi", "bi", "wo2", "bo2", "ln2_g", "ln2_b")


# ------------------------------ in-kernel helpers ------------------------------
def _layernorm(x, gamma, beta, eps=LN_EPS):
    x = x.astype(jnp.float32)
    mu = jnp.mean(x, axis=-1, keepdims=True)
    xc = x - mu
    var = jnp.mean(xc * xc, axis=-1, keepdims=True)
    return xc * jax.lax.rsqrt(var + eps) * gamma + beta


def _gelu_tanh(x):
    # tanh-approximation GELU (EUP slot). Trades exact-erf parity for VALU relief.
    c = jnp.float32(0.7978845608028654)  # sqrt(2/pi)
    return 0.5 * x * (1.0 + jnp.tanh(c * (x + 0.044715 * x * x * x)))


# --------------------------- embedding + LayerNorm -----------------------------
def _embed_ln_kernel(word_ref, pos_ref, tok_ref, g_ref, b_ref, o_ref):
    emb = word_ref[0] + pos_ref[...] + tok_ref[...]                    # [S, H]
    o_ref[0] = _layernorm(emb, g_ref[...], b_ref[...]).astype(o_ref.dtype)


def embed_layernorm(word, pos, tok, gamma, beta):
    B, S, H = word.shape
    return pl.pallas_call(
        _embed_ln_kernel,
        out_shape=jax.ShapeDtypeStruct((B, S, H), jnp.float32),
        grid=(B,),
        in_specs=[
            pl.BlockSpec((1, S, H), lambda b: (b, 0, 0)),
            pl.BlockSpec((S, H), lambda b: (0, 0)),
            pl.BlockSpec((1, H), lambda b: (0, 0)),
            pl.BlockSpec((1, H), lambda b: (0, 0)),
            pl.BlockSpec((1, H), lambda b: (0, 0)),
        ],
        out_specs=pl.BlockSpec((1, S, H), lambda b: (b, 0, 0)),
        compiler_params=pltpu.CompilerParams(dimension_semantics=("parallel",)),
    )(word, pos, tok, gamma.reshape(1, H), beta.reshape(1, H))


# ------------------------- fused encoder stack kernel --------------------------
def _encoder_stack_kernel(h0_ref, bias_ref,
                          wq_ref, bq_ref, wk_ref, bk_ref, wv_ref, bv_ref,
                          wo_ref, bo_ref, ln1g_ref, ln1b_ref,
                          wi_ref, bi_ref, wo2_ref, bo2_ref,
                          ln2g_ref, ln2b_ref,
                          o_ref, h_scr):
    l = pl.program_id(1)

    @pl.when(l == 0)
    def _():
        h_scr[...] = h0_ref[0]                                         # [S, H] f32

    h = h_scr[...]                                                     # [S, H] f32
    hb = h.astype(jnp.bfloat16)
    bias = bias_ref[0]                                                 # [1, S] additive key mask

    # Self-attention. Per-head weights are lane-group padded (HEAD_DIM -> HPAD);
    # padded lanes/rows are zero so they contribute nothing. The head merge is
    # folded into the per-head output-projection accumulation (no concat).
    attn = jnp.zeros_like(h)
    for hd in range(N_HEADS):
        q = jnp.dot(hb, wq_ref[0, hd], preferred_element_type=jnp.float32) + bq_ref[0, hd]
        k = jnp.dot(hb, wk_ref[0, hd], preferred_element_type=jnp.float32) + bk_ref[0, hd]
        v = jnp.dot(hb, wv_ref[0, hd], preferred_element_type=jnp.float32) + bv_ref[0, hd]
        # scores: scale already folded into wq/bq at init.
        s = jax.lax.dot_general(q.astype(jnp.bfloat16), k.astype(jnp.bfloat16),
                                (((1,), (1,)), ((), ())),
                                preferred_element_type=jnp.float32)    # [S, S]
        s = s + bias
        s = s - jnp.max(s, axis=-1, keepdims=True)
        p = jnp.exp(s)
        # approx reciprocal (EUP); use approx=False if bit-level parity is required.
        p = p * pl.reciprocal(jnp.sum(p, axis=-1, keepdims=True), approx=True)
        ctx = jnp.dot(p.astype(jnp.bfloat16), v.astype(jnp.bfloat16),
                      preferred_element_type=jnp.float32)              # [S, HPAD]
        attn = attn + jnp.dot(ctx.astype(jnp.bfloat16), wo_ref[0, hd],
                              preferred_element_type=jnp.float32)      # [S, H]
    attn = attn + bo_ref[0]

    h1 = _layernorm(attn + h, ln1g_ref[0], ln1b_ref[0])

    # Feed-forward (tanh GELU) + residual + LN2.
    ff = jnp.dot(h1.astype(jnp.bfloat16), wi_ref[0],
                 preferred_element_type=jnp.float32) + bi_ref[0]
    ff = _gelu_tanh(ff)
    ff_out = jnp.dot(ff.astype(jnp.bfloat16), wo2_ref[0],
                     preferred_element_type=jnp.float32) + bo2_ref[0]
    h2 = _layernorm(ff_out + h1, ln2g_ref[0], ln2b_ref[0])

    h_scr[...] = h2                                                    # carry to next layer

    @pl.when(l == pl.num_programs(1) - 1)
    def _():
        o_ref[0] = h2.astype(o_ref.dtype)


def encoder_stack(h0, attn_bias, stack):
    B, S, H = h0.shape

    def layer_spec(arr):
        nd = arr.ndim
        return pl.BlockSpec((1,) + tuple(arr.shape[1:]),
                            lambda b, l, nd=nd: (l,) + (0,) * (nd - 1))

    weights = [stack[name] for name in _W_ORDER]
    in_specs = [
        pl.BlockSpec((1, S, H), lambda b, l: (b, 0, 0)),    # activations
        pl.BlockSpec((1, 1, S), lambda b, l: (b, 0, 0)),    # additive key mask
    ] + [layer_spec(w) for w in weights]

    return pl.pallas_call(
        _encoder_stack_kernel,
        out_shape=jax.ShapeDtypeStruct((B, S, H), jnp.float32),
        grid=(B, N_LAYERS),
        in_specs=in_specs,
        out_specs=pl.BlockSpec((1, S, H), lambda b, l: (b, 0, 0)),
        scratch_shapes=[pltpu.VMEM((S, H), jnp.float32)],
        compiler_params=pltpu.CompilerParams(
            dimension_semantics=("parallel", "arbitrary")),
    )(h0, attn_bias, *weights)


# ------------------------------ classifier head --------------------------------
def _head_kernel(cls_ref, w1_ref, b1_ref, w2_ref, b2_ref, inter_ref, logit_ref):
    x = jnp.dot(cls_ref[...].astype(jnp.bfloat16), w1_ref[...],
                preferred_element_type=jnp.float32) + b1_ref[...]
    x = jnp.maximum(x, 0.0)                                            # ReLU
    inter_ref[...] = x.astype(inter_ref.dtype)
    y = jnp.dot(x.astype(jnp.bfloat16), w2_ref[...],
                preferred_element_type=jnp.float32) + b2_ref[...]
    logit_ref[...] = y.astype(logit_ref.dtype)                         # lane-dense [B, 128]


def classifier_head(cls, params):
    B, H = cls.shape

    def fs(shape):
        return pl.BlockSpec(shape, lambda i, n=len(shape): (0,) * n)

    return pl.pallas_call(
        _head_kernel,
        out_shape=(jax.ShapeDtypeStruct((B, FC1_DIM), jnp.float32),
                   jax.ShapeDtypeStruct((B, LOGIT_PAD), jnp.float32)),
        grid=(1,),
        in_specs=[fs((B, H)), fs((H, FC1_DIM)), fs((1, FC1_DIM)),
                  fs((FC1_DIM, LOGIT_PAD)), fs((1, LOGIT_PAD))],
        out_specs=(fs((B, FC1_DIM)), fs((B, LOGIT_PAD))),
    )(cls, params["fc1_w"], params["fc1_b"].reshape(1, FC1_DIM),
      params["fc2_w_pad"], params["fc2_b_pad"])


# ------------------------------ parameter setup -------------------------------
def init_params(key):
    def nrm(k, shape, scale=0.02):
        return scale * jax.random.normal(k, shape, dtype=jnp.float32)

    def pad_last(w, to):
        pad = [(0, 0)] * (w.ndim - 1) + [(0, to - w.shape[-1])]
        return jnp.pad(w, pad)

    keys = iter(jax.random.split(key, 256))
    p = {
        "word_emb": nrm(next(keys), (VOCAB, HIDDEN)),
        "pos_emb": nrm(next(keys), (MAX_POS, HIDDEN)),
        "type_emb": nrm(next(keys), (2, HIDDEN)),
        "emb_ln_g": jnp.ones((HIDDEN,), jnp.float32),
        "emb_ln_b": jnp.zeros((HIDDEN,), jnp.float32),
        "fc1_w": nrm(next(keys), (HIDDEN, FC1_DIM)).astype(jnp.bfloat16),
        "fc1_b": jnp.zeros((FC1_DIM,), jnp.float32),
    }
    # fc2 zero-padded to a lane-dense [FC1_DIM, 128] block; wrapper slices 2 classes.
    fc2_w = nrm(next(keys), (FC1_DIM, N_CLASSES))
    p["fc2_w_pad"] = pad_last(fc2_w, LOGIT_PAD).astype(jnp.bfloat16)
    p["fc2_b_pad"] = jnp.zeros((1, LOGIT_PAD), jnp.float32)

    layers = []
    for _ in range(N_LAYERS):
        # Per-head Q/K/V weights, lane-group padded HEAD_DIM -> HPAD; scale folded into Q.
        wq = nrm(next(keys), (N_HEADS, HIDDEN, HEAD_DIM)) * ATTN_SCALE
        wk = nrm(next(keys), (N_HEADS, HIDDEN, HEAD_DIM))
        wv = nrm(next(keys), (N_HEADS, HIDDEN, HEAD_DIM))
        wo = nrm(next(keys), (N_HEADS, HEAD_DIM, HIDDEN))  # per-head row block of Wo
        wo_pad = jnp.pad(wo, ((0, 0), (0, HPAD - HEAD_DIM), (0, 0)))
        layers.append({
            "wq": pad_last(wq, HPAD).astype(jnp.bfloat16),
            "bq": jnp.zeros((N_HEADS, 1, HPAD), jnp.float32),
            "wk": pad_last(wk, HPAD).astype(jnp.bfloat16),
            "bk": jnp.zeros((N_HEADS, 1, HPAD), jnp.float32),
            "wv": pad_last(wv, HPAD).astype(jnp.bfloat16),
            "bv": jnp.zeros((N_HEADS, 1, HPAD), jnp.float32),
            "wo": wo_pad.astype(jnp.bfloat16),
            "bo": jnp.zeros((1, HIDDEN), jnp.float32),
            "ln1_g": jnp.ones((1, HIDDEN), jnp.float32),
            "ln1_b": jnp.zeros((1, HIDDEN), jnp.float32),
            "wi": nrm(next(keys), (HIDDEN, INTERMEDIATE)).astype(jnp.bfloat16),
            "bi": jnp.zeros((1, INTERMEDIATE), jnp.float32),
            "wo2": nrm(next(keys), (INTERMEDIATE, HIDDEN)).astype(jnp.bfloat16),
            "bo2": jnp.zeros((1, HIDDEN), jnp.float32),
            "ln2_g": jnp.ones((1, HIDDEN), jnp.float32),
            "ln2_b": jnp.zeros((1, HIDDEN), jnp.float32),
        })
    # Stack per-layer weights along a leading [L] axis for the fused-stack kernel.
    p["stack"] = {name: jnp.stack([lyr[name] for lyr in layers]) for name in _W_ORDER}
    return p


# --------------------------------- forward ------------------------------------
def bert_classifier_forward(X, params):
    # X: [B, 2, S]; row 0 = input_ids, row 1 = attention_mask (torch module convention).
    input_ids = X[:, 0, :].astype(jnp.int32)
    attn_mask = X[:, 1, :].astype(jnp.int32)
    B, S = input_ids.shape

    # Embedding gather is plain-JAX glue; sum + LayerNorm fused in one kernel.
    word = jnp.take(params["word_emb"], input_ids, axis=0)             # [B, S, H]
    pos = params["pos_emb"][:S]                                        # [S, H]
    tok = params["type_emb"][0:1]                                      # [1, H] (token_type_ids = 0)
    h = embed_layernorm(word, pos, tok, params["emb_ln_g"], params["emb_ln_b"])

    # HF-style additive key-padding mask, per batch: [B, 1, S].
    attn_bias = ((1.0 - attn_mask.astype(jnp.float32)) * -10000.0).reshape(B, 1, S)

    # All encoder layers in one pallas_call (activation stays VMEM-resident).
    h = encoder_stack(h, attn_bias, params["stack"])

    # Classifier head on the CLS token.
    cls = h[:, 0, :]                                                   # [B, H]
    intermediate, logits_pad = classifier_head(cls, params)
    return intermediate, logits_pad[:, :N_CLASSES]


# ----------------------------------- main --------------------------------------
if __name__ == "__main__":
    key = jax.random.PRNGKey(0)
    k_param, k_ids = jax.random.split(key)

    params = init_params(k_param)

    input_ids = jax.random.randint(k_ids, (BATCH, SEQ), 1, VOCAB, dtype=jnp.int32)
    attention_mask = jnp.ones((BATCH, SEQ), dtype=jnp.int32)
    attention_mask = attention_mask.at[1, SEQ - 3:].set(0)             # some padding in batch 1

    # Pack like the torch module expects: X[:, 0, :] = ids, X[:, 1, :] = mask
    X = jnp.stack([input_ids.astype(jnp.float32),
                   attention_mask.astype(jnp.float32)], axis=1)        # [B, 2, S]

    fwd = jax.jit(bert_classifier_forward)
    intermediate, logits = fwd(X, params)
    jax.block_until_ready((intermediate, logits))

    assert intermediate.shape == (BATCH, FC1_DIM)
    assert logits.shape == (BATCH, N_CLASSES)
    assert bool(jnp.all(jnp.isfinite(intermediate))) and bool(jnp.all(jnp.isfinite(logits)))
    print("KERNEL_OK")
</pallas_src>

<mosaic_0001>
module attributes {stable_mosaic.version = 11 : i64} {
  func.func @_head_kernel(%arg0: i32, %arg1: memref<2x128xf32, #tpu.memory_space<vmem>>, %arg2: memref<128x512xbf16, #tpu.memory_space<vmem>>, %arg3: memref<1x512xf32, #tpu.memory_space<vmem>>, %arg4: memref<512x128xbf16, #tpu.memory_space<vmem>>, %arg5: memref<1x128xf32, #tpu.memory_space<vmem>>, %arg6: memref<2x512xf32, #tpu.memory_space<vmem>>, %arg7: memref<2x128xf32, #tpu.memory_space<vmem>>) attributes {dimension_semantics = [#tpu.dimension_semantics<arbitrary>], iteration_bounds = array<i64: 1>, scalar_prefetch = 0 : i64, scratch_operands = 0 : i64, tpu.core_type = #tpu.core_type<tc>, window_params = [{pipeline_mode = #tpu.pipeline_mode<synchronous>, transform_indices = @transform_0, window_bounds = array<i64: 2, 128>}, {pipeline_mode = #tpu.pipeline_mode<synchronous>, transform_indices = @transform_1, window_bounds = array<i64: 128, 512>}, {pipeline_mode = #tpu.pipeline_mode<synchronous>, transform_indices = @transform_2, window_bounds = array<i64: 1, 512>}, {pipeline_mode = #tpu.pipeline_mode<synchronous>, transform_indices = @transform_3, window_bounds = array<i64: 512, 128>}, {pipeline_mode = #tpu.pipeline_mode<synchronous>, transform_indices = @transform_4, window_bounds = array<i64: 1, 128>}, {pipeline_mode = #tpu.pipeline_mode<synchronous>, transform_indices = @transform_5, window_bounds = array<i64: 2, 512>}, {pipeline_mode = #tpu.pipeline_mode<synchronous>, transform_indices = @transform_6, window_bounds = array<i64: 2, 128>}]} {
    %c0 = arith.constant 0 : index
    %c0_0 = arith.constant 0 : index
    %0 = vector.load %arg1[%c0, %c0_0] : memref<2x128xf32, #tpu.memory_space<vmem>>, vector<2x128xf32>
    %1 = arith.truncf %0 : vector<2x128xf32> to vector<2x128xbf16>
    %c0_1 = arith.constant 0 : index
    %c0_2 = arith.constant 0 : index
    %2 = vector.load %arg2[%c0_1, %c0_2] : memref<128x512xbf16, #tpu.memory_space<vmem>>, vector<128x512xbf16>
    %cst = arith.constant dense<0.000000e+00> : vector<2x512xf32>
    %3 = tpu.matmul %1, %2, %cst {dimension_numbers = #tpu.dot_dimension_numbers<[1], [0], [0], [1], [0, 0, 1, 1], [], []>} : vector<2x128xbf16>, vector<128x512xbf16>, vector<2x512xf32> -> vector<2x512xf32>
    %c0_3 = arith.constant 0 : index
    %c0_4 = arith.constant 0 : index
    %4 = vector.load %arg3[%c0_3, %c0_4] : memref<1x512xf32, #tpu.memory_space<vmem>>, vector<1x512xf32>
    %5 = vector.broadcast %4 : vector<1x512xf32> to vector<2x512xf32>
    %6 = arith.addf %3, %5 : vector<2x512xf32>
    %cst_5 = arith.constant 0.000000e+00 : f32
    %7 = vector.broadcast %cst_5 : f32 to vector<2x512xf32>
    %8 = arith.maximumf %6, %7 : vector<2x512xf32>
    %c0_6 = arith.constant 0 : index
    %c0_7 = arith.constant 0 : index
    %9 = vector.load %arg6[%c0_6, %c0_7] : memref<2x512xf32, #tpu.memory_space<vmem>>, vector<2x512xf32>
    tpu.vector_store %arg6[%c0_6, %c0_7], %8 {strides = array<i32>} : memref<2x512xf32, #tpu.memory_space<vmem>>, vector<2x512xf32>,
    %10 = arith.truncf %8 : vector<2x512xf32> to vector<2x512xbf16>
    %c0_8 = arith.constant 0 : index
    %c0_9 = arith.constant 0 : index
    %11 = vector.load %arg4[%c0_8, %c0_9] : memref<512x128xbf16, #tpu.memory_space<vmem>>, vector<512x128xbf16>
    %cst_10 = arith.constant dense<0.000000e+00> : vector<2x128xf32>
    %12 = tpu.matmul %10, %11, %cst_10 {dimension_numbers = #tpu.dot_dimension_numbers<[1], [0], [0], [1], [0, 0, 1, 1], [], []>} : vector<2x512xbf16>, vector<512x128xbf16>, vector<2x128xf32> -> vector<2x128xf32>
    %c0_11 = arith.constant 0 : index
    %c0_12 = arith.constant 0 : index
    %13 = vector.load %arg5[%c0_11, %c0_12] : memref<1x128xf32, #tpu.memory_space<vmem>>, vector<1x128xf32>
    %14 = vector.broadcast %13 : vector<1x128xf32> to vector<2x128xf32>
    %15 = arith.addf %12, %14 : vector<2x128xf32>
    %c0_13 = arith.constant 0 : index
    %c0_14 = arith.constant 0 : index
    %16 = vector.load %arg7[%c0_13, %c0_14] : memref<2x128xf32, #tpu.memory_space<vmem>>, vector<2x128xf32>
    tpu.vector_store %arg7[%c0_13, %c0_14], %15 {strides = array<i32>} : memref<2x128xf32, #tpu.memory_space<vmem>>, vector<2x128xf32>,
    return
  }
  func.func @transform_0(%arg0: i32) -> (i32, i32) {
    %c0_i32 = arith.constant 0 : i32
    %c0_i32_0 = arith.constant 0 : i32
    %c0_i32_1 = arith.constant 0 : i32
    return %c0_i32, %c0_i32_0 : i32, i32
  }
  func.func @transform_1(%arg0: i32) -> (i32, i32) {
    %c0_i32 = arith.constant 0 : i32
    %c0_i32_0 = arith.constant 0 : i32
    %c0_i32_1 = arith.constant 0 : i32
    return %c0_i32, %c0_i32_0 : i32, i32
  }
  func.func @transform_2(%arg0: i32) -> (i32, i32) {
    %c0_i32 = arith.constant 0 : i32
    %c0_i32_0 = arith.constant 0 : i32
    %c0_i32_1 = arith.constant 0 : i32
    return %c0_i32, %c0_i32_0 : i32, i32
  }
  func.func @transform_3(%arg0: i32) -> (i32, i32) {
    %c0_i32 = arith.constant 0 : i32
    %c0_i32_0 = arith.constant 0 : i32
    %c0_i32_1 = arith.constant 0 : i32
    return %c0_i32, %c0_i32_0 : i32, i32
  }
  func.func @transform_4(%arg0: i32) -> (i32, i32) {
    %c0_i32 = arith.constant 0 : i32
    %c0_i32_0 = arith.constant 0 : i32
    %c0_i32_1 = arith.constant 0 : i32
    return %c0_i32, %c0_i32_0 : i32, i32
  }
  func.func @transform_5(%arg0: i32) -> (i32, i32) {
    %c0_i32 = arith.constant 0 : i32
    %c0_i32_0 = arith.constant 0 : i32
    %c0_i32_1 = arith.constant 0 : i32
    return %c0_i32, %c0_i32_0 : i32, i32
  }
  func.func @transform_6(%arg0: i32) -> (i32, i32) {
    %c0_i32 = arith.constant 0 : i32
    %c0_i32_0 = arith.constant 0 : i32
    %c0_i32_1 = arith.constant 0 : i32
    return %c0_i32, %c0_i32_0 : i32, i32
  }
}

module attributes {stable_mosaic.version = 11 : i64} {
  func.func @_embed_ln_kernel(%arg0: i32, %arg1: memref<1x8x128xf32, #tpu.memory_space<vmem>>, %arg2: memref<8x128xf32, #tpu.memory_space<vmem>>, %arg3: memref<1x128xf32, #tpu.memory_space<vmem>>, %arg4: memref<1x128xf32, #tpu.memory_space<vmem>>, %arg5: memref<1x128xf32, #tpu.memory_space<vmem>>, %arg6: memref<1x8x128xf32, #tpu.memory_space<vmem>>) attributes {dimension_semantics = [#tpu.dimension_semantics<parallel>], iteration_bounds = array<i64: 2>, scalar_prefetch = 0 : i64, scratch_operands = 0 : i64, tpu.core_type = #tpu.core_type<tc>, window_params = [{transform_indices = @transform_0, window_bounds = array<i64: 1, 8, 128>}, {pipeline_mode = #tpu.pipeline_mode<synchronous>, transform_indices = @transform_1, window_bounds = array<i64: 8, 128>}, {pipeline_mode = #tpu.pipeline_mode<synchronous>, transform_indices = @transform_2, window_bounds = array<i64: 1, 128>}, {pipeline_mode = #tpu.pipeline_mode<synchronous>, transform_indices = @transform_3, window_bounds = array<i64: 1, 128>}, {pipeline_mode = #tpu.pipeline_mode<synchronous>, transform_indices = @transform_4, window_bounds = array<i64: 1, 128>}, {transform_indices = @transform_5, window_bounds = array<i64: 1, 8, 128>}]} {
    %c0 = arith.constant 0 : index
    %c0_0 = arith.constant 0 : index
    %c0_1 = arith.constant 0 : index
    %0 = vector.load %arg1[%c0, %c0_0, %c0_1] : memref<1x8x128xf32, #tpu.memory_space<vmem>>, vector<1x8x128xf32>
    %1 = vector.shape_cast %0 : vector<1x8x128xf32> to vector<8x128xf32>
    %c0_2 = arith.constant 0 : index
    %c0_3 = arith.constant 0 : index
    %2 = vector.load %arg2[%c0_2, %c0_3] : memref<8x128xf32, #tpu.memory_space<vmem>>, vector<8x128xf32>
    %3 = arith.addf %1, %2 : vector<8x128xf32>
    %c0_4 = arith.constant 0 : index
    %c0_5 = arith.constant 0 : index
    %4 = vector.load %arg3[%c0_4, %c0_5] : memref<1x128xf32, #tpu.memory_space<vmem>>, vector<1x128xf32>
    %5 = vector.broadcast %4 : vector<1x128xf32> to vector<8x128xf32>
    %6 = arith.addf %3, %5 : vector<8x128xf32>
    %c0_6 = arith.constant 0 : index
    %c0_7 = arith.constant 0 : index
    %7 = vector.load %arg4[%c0_6, %c0_7] : memref<1x128xf32, #tpu.memory_space<vmem>>, vector<1x128xf32>
    %c0_8 = arith.constant 0 : index
    %c0_9 = arith.constant 0 : index
    %8 = vector.load %arg5[%c0_8, %c0_9] : memref<1x128xf32, #tpu.memory_space<vmem>>, vector<1x128xf32>
    %cst = arith.constant dense<0.000000e+00> : vector<8xf32>
    %9 = vector.multi_reduction <add>, %6, %cst [1] : vector<8x128xf32> to vector<8xf32>
    %10 = vector.shape_cast %9 : vector<8xf32> to vector<8x1xf32>
    %cst_10 = arith.constant 1.280000e+02 : f32
    %11 = vector.broadcast %cst_10 : f32 to vector<8x1xf32>
    %12 = arith.divf %10, %11 : vector<8x1xf32>
    %13 = vector.broadcast %12 : vector<8x1xf32> to vector<8x128xf32>
    %14 = arith.subf %6, %13 : vector<8x128xf32>
    %15 = arith.mulf %14, %14 : vector<8x128xf32>
    %cst_11 = arith.constant dense<0.000000e+00> : vector<8xf32>
    %16 = vector.multi_reduction <add>, %15, %cst_11 [1] : vector<8x128xf32> to vector<8xf32>
    %17 = vector.shape_cast %16 : vector<8xf32> to vector<8x1xf32>
    %cst_12 = arith.constant 1.280000e+02 : f32
    %18 = vector.broadcast %cst_12 : f32 to vector<8x1xf32>
    %19 = arith.divf %17, %18 : vector<8x1xf32>
    %cst_13 = arith.constant 9.99999996E-13 : f32
    %20 = vector.broadcast %cst_13 : f32 to vector<8x1xf32>
    %21 = arith.addf %19, %20 : vector<8x1xf32>
    %22 = math.rsqrt %21 : vector<8x1xf32>
    %23 = vector.broadcast %22 : vector<8x1xf32> to vector<8x128xf32>
    %24 = arith.mulf %14, %23 : vector<8x128xf32>
    %25 = vector.broadcast %7 : vector<1x128xf32> to vector<8x128xf32>
    %26 = arith.mulf %24, %25 : vector<8x128xf32>
    %27 = vector.broadcast %8 : vector<1x128xf32> to vector<8x128xf32>
    %28 = arith.addf %26, %27 : vector<8x128xf32>
    %c0_14 = arith.constant 0 : index
    %c0_15 = arith.constant 0 : index
    %c0_16 = arith.constant 0 : index
    %29 = vector.load %arg6[%c0_14, %c0_15, %c0_16] : memref<1x8x128xf32, #tpu.memory_space<vmem>>, vector<1x8x128xf32>
    %30 = vector.shape_cast %29 : vector<1x8x128xf32> to vector<8x128xf32>
    %31 = vector.shape_cast %28 : vector<8x128xf32> to vector<1x8x128xf32>
    tpu.vector_store %arg6[%c0_14, %c0_15, %c0_16], %31 {strides = array<i32>} : memref<1x8x128xf32, #tpu.memory_space<vmem>>, vector<1x8x128xf32>,
    return
  }
  func.func @transform_0(%arg0: i32) -> (i32, i32, i32) {
    %c0_i32 = arith.constant 0 : i32
    %c0_i32_0 = arith.constant 0 : i32
    %c0_i32_1 = arith.constant 0 : i32
    return %arg0, %c0_i32, %c0_i32_0 : i32, i32, i32
  }
  func.func @transform_1(%arg0: i32) -> (i32, i32) {
    %c0_i32 = arith.constant 0 : i32
    %c0_i32_0 = arith.constant 0 : i32
    %c0_i32_1 = arith.constant 0 : i32
    return %c0_i32, %c0_i32_0 : i32, i32
  }
  func.func @transform_2(%arg0: i32) -> (i32, i32) {
    %c0_i32 = arith.constant 0 : i32
    %c0_i32_0 = arith.constant 0 : i32
    %c0_i32_1 = arith.constant 0 : i32
    return %c0_i32, %c0_i32_0 : i32, i32
  }
  func.func @transform_3(%arg0: i32) -> (i32, i32) {
    %c0_i32 = arith.constant 0 : i32
    %c0_i32_0 = arith.constant 0 : i32
    %c0_i32_1 = arith.constant 0 : i32
    return %c0_i32, %c0_i32_0 : i32, i32
  }
  func.func @transform_4(%arg0: i32) -> (i32, i32) {
    %c0_i32 = arith.constant 0 : i32
    %c0_i32_0 = arith.constant 0 : i32
    %c0_i32_1 = arith.constant 0 : i32
    return %c0_i32, %c0_i32_0 : i32, i32
  }
  func.func @transform_5(%arg0: i32) -> (i32, i32, i32) {
    %c0_i32 = arith.constant 0 : i32
    %c0_i32_0 = arith.constant 0 : i32
    %c0_i32_1 = arith.constant 0 : i32
    return %arg0, %c0_i32, %c0_i32_0 : i32, i32, i32
  }
}

module attributes {stable_mosaic.version = 11 : i64} {
  func.func @_encoder_stack_kernel(%arg0: i32, %arg1: i32, %arg2: memref<1x8x128xf32, #tpu.memory_space<vmem>>, %arg3: memref<1x1x8xf32, #tpu.memory_space<vmem>>, %arg4: memref<1x2x128x128xbf16, #tpu.memory_space<vmem>>, %arg5: memref<1x2x1x128xf32, #tpu.memory_space<vmem>>, %arg6: memref<1x2x128x128xbf16, #tpu.memory_space<vmem>>, %arg7: memref<1x2x1x128xf32, #tpu.memory_space<vmem>>, %arg8: memref<1x2x128x128xbf16, #tpu.memory_space<vmem>>, %arg9: memref<1x2x1x128xf32, #tpu.memory_space<vmem>>, %arg10: memref<1x2x128x128xbf16, #tpu.memory_space<vmem>>, %arg11: memref<1x1x128xf32, #tpu.memory_space<vmem>>, %arg12: memref<1x1x128xf32, #tpu.memory_space<vmem>>, %arg13: memref<1x1x128xf32, #tpu.memory_space<vmem>>, %arg14: memref<1x128x256xbf16, #tpu.memory_space<vmem>>, %arg15: memref<1x1x256xf32, #tpu.memory_space<vmem>>, %arg16: memref<1x256x128xbf16, #tpu.memory_space<vmem>>, %arg17: memref<1x1x128xf32, #tpu.memory_space<vmem>>, %arg18: memref<1x1x128xf32, #tpu.memory_space<vmem>>, %arg19: memref<1x1x128xf32, #tpu.memory_space<vmem>>, %arg20: memref<1x8x128xf32, #tpu.memory_space<vmem>>, %arg21: memref<8x128xf32, #tpu.memory_space<vmem>>) attributes {dimension_semantics = [#tpu.dimension_semantics<parallel>, #tpu.dimension_semantics<arbitrary>], iteration_bounds = array<i64: 2, 2>, scalar_prefetch = 0 : i64, scratch_operands = 1 : i64, tpu.core_type = #tpu.core_type<tc>, window_params = [{transform_indices = @transform_0, window_bounds = array<i64: 1, 8, 128>}, {transform_indices = @transform_1, window_bounds = array<i64: 1, 1, 8>}, {transform_indices = @transform_2, window_bounds = array<i64: 1, 2, 128, 128>}, {transform_indices = @transform_3, window_bounds = array<i64: 1, 2, 1, 128>}, {transform_indices = @transform_4, window_bounds = array<i64: 1, 2, 128, 128>}, {transform_indices = @transform_5, window_bounds = array<i64: 1, 2, 1, 128>}, {transform_indices = @transform_6, window_bounds = array<i64: 1, 2, 128, 128>}, {transform_indices = @transform_7, window_bounds = array<i64: 1, 2, 1, 128>}, {transform_indices = @transform_8, window_bounds = array<i64: 1, 2, 128, 128>}, {transform_indices = @transform_9, window_bounds = array<i64: 1, 1, 128>}, {transform_indices = @transform_10, window_bounds = array<i64: 1, 1, 128>}, {transform_indices = @transform_11, window_bounds = array<i64: 1, 1, 128>}, {transform_indices = @transform_12, window_bounds = array<i64: 1, 128, 256>}, {transform_indices = @transform_13, window_bounds = array<i64: 1, 1, 256>}, {transform_indices = @transform_14, window_bounds = array<i64: 1, 256, 128>}, {transform_indices = @transform_15, window_bounds = array<i64: 1, 1, 128>}, {transform_indices = @transform_16, window_bounds = array<i64: 1, 1, 128>}, {transform_indices = @transform_17, window_bounds = array<i64: 1, 1, 128>}, {transform_indices = @transform_18, window_bounds = array<i64: 1, 8, 128>}]} {
    %c0_i32 = arith.constant 0 : i32
    %0 = arith.cmpi eq, %arg1, %c0_i32 : i32
    %1 = arith.extui %0 : i1 to i32
    %c0_i32_0 = arith.constant 0 : i32
    %2 = arith.cmpi ne, %1, %c0_i32_0 : i32
    scf.if %2 {
      %c0_122 = arith.constant 0 : index
      %c0_123 = arith.constant 0 : index
      %c0_124 = arith.constant 0 : index
      %183 = vector.load %arg2[%c0_122, %c0_123, %c0_124] : memref<1x8x128xf32, #tpu.memory_space<vmem>>, vector<1x8x128xf32>
      %184 = vector.shape_cast %183 : vector<1x8x128xf32> to vector<8x128xf32>
      %c0_125 = arith.constant 0 : index
      %c0_126 = arith.constant 0 : index
      %185 = vector.load %arg21[%c0_125, %c0_126] : memref<8x128xf32, #tpu.memory_space<vmem>>, vector<8x128xf32>
      tpu.vector_store %arg21[%c0_125, %c0_126], %184 {strides = array<i32>} : memref<8x128xf32, #tpu.memory_space<vmem>>, vector<8x128xf32>,
    } else {
    }
    %c0 = arith.constant 0 : index
    %c0_1 = arith.constant 0 : index
    %3 = vector.load %arg21[%c0, %c0_1] : memref<8x128xf32, #tpu.memory_space<vmem>>, vector<8x128xf32>
    %4 = arith.truncf %3 : vector<8x128xf32> to vector<8x128xbf16>
    %c0_2 = arith.constant 0 : index
    %c0_3 = arith.constant 0 : index
    %c0_4 = arith.constant 0 : index
    %5 = vector.load %arg3[%c0_2, %c0_3, %c0_4] : memref<1x1x8xf32, #tpu.memory_space<vmem>>, vector<1x1x8xf32>
    %6 = vector.shape_cast %5 : vector<1x1x8xf32> to vector<1x8xf32>
    %cst = arith.constant 0.000000e+00 : f32
    %7 = vector.broadcast %cst : f32 to vector<8x128xf32>
    %c0_5 = arith.constant 0 : index
    %c0_6 = arith.constant 0 : index
    %c0_7 = arith.constant 0 : index
    %c0_8 = arith.constant 0 : index
    %8 = vector.load %arg4[%c0_5, %c0_6, %c0_7, %c0_8] : memref<1x2x128x128xbf16, #tpu.memory_space<vmem>>, vector<1x1x128x128xbf16>
    %9 = vector.shape_cast %8 : vector<1x1x128x128xbf16> to vector<128x128xbf16>
    %cst_9 = arith.constant dense<0.000000e+00> : vector<8x128xf32>
    %10 = tpu.matmul %4, %9, %cst_9 {dimension_numbers = #tpu.dot_dimension_numbers<[1], [0], [0], [1], [0, 0, 1, 1], [], []>} : vector<8x128xbf16>, vector<128x128xbf16>, vector<8x128xf32> -> vector<8x128xf32>
    %c0_10 = arith.constant 0 : index
    %c0_11 = arith.constant 0 : index
    %c0_12 = arith.constant 0 : index
    %c0_13 = arith.constant 0 : index
    %11 = vector.load %arg5[%c0_10, %c0_11, %c0_12, %c0_13] : memref<1x2x1x128xf32, #tpu.memory_space<vmem>>, vector<1x1x1x128xf32>
    %12 = vector.shape_cast %11 : vector<1x1x1x128xf32> to vector<1x128xf32>
    %13 = vector.broadcast %12 : vector<1x128xf32> to vector<8x128xf32>
    %14 = arith.addf %10, %13 : vector<8x128xf32>
    %c0_14 = arith.constant 0 : index
    %c0_15 = arith.constant 0 : index
    %c0_16 = arith.constant 0 : index
    %c0_17 = arith.constant 0 : index
    %15 = vector.load %arg6[%c0_14, %c0_15, %c0_16, %c0_17] : memref<1x2x128x128xbf16, #tpu.memory_space<vmem>>, vector<1x1x128x128xbf16>
    %16 = vector.shape_cast %15 : vector<1x1x128x128xbf16> to vector<128x128xbf16>
    %cst_18 = arith.constant dense<0.000000e+00> : vector<8x128xf32>
    %17 = tpu.matmul %4, %16, %cst_18 {dimension_numbers = #tpu.dot_dimension_numbers<[1], [0], [0], [1], [0, 0, 1, 1], [], []>} : vector<8x128xbf16>, vector<128x128xbf16>, vector<8x128xf32> -> vector<8x128xf32>
    %c0_19 = arith.constant 0 : index
    %c0_20 = arith.constant 0 : index
    %c0_21 = arith.constant 0 : index
    %c0_22 = arith.constant 0 : index
    %18 = vector.load %arg7[%c0_19, %c0_20, %c0_21, %c0_22] : memref<1x2x1x128xf32, #tpu.memory_space<vmem>>, vector<1x1x1x128xf32>
    %19 = vector.shape_cast %18 : vector<1x1x1x128xf32> to vector<1x128xf32>
    %20 = vector.broadcast %19 : vector<1x128xf32> to vector<8x128xf32>
    %21 = arith.addf %17, %20 : vector<8x128xf32>
    %c0_23 = arith.constant 0 : index
    %c0_24 = arith.constant 0 : index
    %c0_25 = arith.constant 0 : index
    %c0_26 = arith.constant 0 : index
    %22 = vector.load %arg8[%c0_23, %c0_24, %c0_25, %c0_26] : memref<1x2x128x128xbf16, #tpu.memory_space<vmem>>, vector<1x1x128x128xbf16>
    %23 = vector.shape_cast %22 : vector<1x1x128x128xbf16> to vector<128x128xbf16>
    %cst_27 = arith.constant dense<0.000000e+00> : vector<8x128xf32>
    %24 = tpu.matmul %4, %23, %cst_27 {dimension_numbers = #tpu.dot_dimension_numbers<[1], [0], [0], [1], [0, 0, 1, 1], [], []>} : vector<8x128xbf16>, vector<128x128xbf16>, vector<8x128xf32> -> vector<8x128xf32>
    %c0_28 = arith.constant 0 : index
    %c0_29 = arith.constant 0 : index
    %c0_30 = arith.constant 0 : index
    %c0_31 = arith.constant 0 : index
    %25 = vector.load %arg9[%c0_28, %c0_29, %c0_30, %c0_31] : memref<1x2x1x128xf32, #tpu.memory_space<vmem>>, vector<1x1x1x128xf32>
    %26 = vector.shape_cast %25 : vector<1x1x1x128xf32> to vector<1x128xf32>
    %27 = vector.broadcast %26 : vector<1x128xf32> to vector<8x128xf32>
    %28 = arith.addf %24, %27 : vector<8x128xf32>
    %29 = arith.truncf %14 : vector<8x128xf32> to vector<8x128xbf16>
    %30 = arith.truncf %21 : vector<8x128xf32> to vector<8x128xbf16>
    %cst_32 = arith.constant dense<0.000000e+00> : vector<8x8xf32>
    %31 = tpu.matmul %29, %30, %cst_32 {dimension_numbers = #tpu.dot_dimension_numbers<[1], [1], [0], [0], [0, 0, 1, 0], [], []>} : vector<8x128xbf16>, vector<8x128xbf16>, vector<8x8xf32> -> vector<8x8xf32>
    %32 = vector.broadcast %6 : vector<1x8xf32> to vector<8x8xf32>
    %33 = arith.addf %31, %32 : vector<8x8xf32>
    %cst_33 = arith.constant dense<0xFF800000> : vector<8xf32>
    %34 = vector.multi_reduction <maximumf>, %33, %cst_33 [1] : vector<8x8xf32> to vector<8xf32>
    %35 = vector.shape_cast %34 : vector<8xf32> to vector<8x1xf32>
    %36 = vector.broadcast %35 : vector<8x1xf32> to vector<8x8xf32>
    %37 = arith.subf %33, %36 : vector<8x8xf32>
    %38 = math.exp %37 : vector<8x8xf32>
    %cst_34 = arith.constant dense<0.000000e+00> : vector<8xf32>
    %39 = vector.multi_reduction <add>, %38, %cst_34 [1] : vector<8x8xf32> to vector<8xf32>
    %40 = vector.shape_cast %39 : vector<8xf32> to vector<8x1xf32>
    %41 = tpu.reciprocal %40 {approx = true} : vector<8x1xf32> -> vector<8x1xf32>
    %42 = vector.broadcast %41 : vector<8x1xf32> to vector<8x8xf32>
    %43 = arith.mulf %38, %42 : vector<8x8xf32>
    %44 = arith.truncf %43 : vector<8x8xf32> to vector<8x8xbf16>
    %45 = arith.truncf %28 : vector<8x128xf32> to vector<8x128xbf16>
    %cst_35 = arith.constant dense<0.000000e+00> : vector<8x128xf32>
    %46 = tpu.matmul %44, %45, %cst_35 {dimension_numbers = #tpu.dot_dimension_numbers<[1], [0], [0], [1], [0, 0, 1, 1], [], []>} : vector<8x8xbf16>, vector<8x128xbf16>, vector<8x128xf32> -> vector<8x128xf32>
    %47 = arith.truncf %46 : vector<8x128xf32> to vector<8x128xbf16>
    %c0_36 = arith.constant 0 : index
    %c0_37 = arith.constant 0 : index
    %c0_38 = arith.constant 0 : index
    %c0_39 = arith.constant 0 : index
    %48 = vector.load %arg10[%c0_36, %c0_37, %c0_38, %c0_39] : memref<1x2x128x128xbf16, #tpu.memory_space<vmem>>, vector<1x1x128x128xbf16>
    %49 = vector.shape_cast %48 : vector<1x1x128x128xbf16> to vector<128x128xbf16>
    %cst_40 = arith.constant dense<0.000000e+00> : vector<8x128xf32>
    %50 = tpu.matmul %47, %49, %cst_40 {dimension_numbers = #tpu.dot_dimension_numbers<[1], [0], [0], [1], [0, 0, 1, 1], [], []>} : vector<8x128xbf16>, vector<128x128xbf16>, vector<8x128xf32> -> vector<8x128xf32>
    %51 = arith.addf %7, %50 : vector<8x128xf32>
    %c0_41 = arith.constant 0 : index
    %c1 = arith.constant 1 : index
    %c0_42 = arith.constant 0 : index
    %c0_43 = arith.constant 0 : index
    %52 = vector.load %arg4[%c0_41, %c1, %c0_42, %c0_43] : memref<1x2x128x128xbf16, #tpu.memory_space<vmem>>, vector<1x1x128x128xbf16>
    %53 = vector.shape_cast %52 : vector<1x1x128x128xbf16> to vector<128x128xbf16>
    %cst_44 = arith.constant dense<0.000000e+00> : vector<8x128xf32>
    %54 = tpu.matmul %4, %53, %cst_44 {dimension_numbers = #tpu.dot_dimension_numbers<[1], [0], [0], [1], [0, 0, 1, 1], [], []>} : vector<8x128xbf16>, vector<128x128xbf16>, vector<8x128xf32> -> vector<8x128xf32>
    %c0_45 = arith.constant 0 : index
    %c1_46 = arith.constant 1 : index
    %c0_47 = arith.constant 0 : index
    %c0_48 = arith.constant 0 : index
    %55 = vector.load %arg5[%c0_45, %c1_46, %c0_47, %c0_48] : memref<1x2x1x128xf32, #tpu.memory_space<vmem>>, vector<1x1x1x128xf32>
    %56 = vector.shape_cast %55 : vector<1x1x1x128xf32> to vector<1x128xf32>
    %57 = vector.broadcast %56 : vector<1x128xf32> to vector<8x128xf32>
    %58 = arith.addf %54, %57 : vector<8x128xf32>
    %c0_49 = arith.constant 0 : index
    %c1_50 = arith.constant 1 : index
    %c0_51 = arith.constant 0 : index
    %c0_52 = arith.constant 0 : index
    %59 = vector.load %arg6[%c0_49, %c1_50, %c0_51, %c0_52] : memref<1x2x128x128xbf16, #tpu.memory_space<vmem>>, vector<1x1x128x128xbf16>
    %60 = vector.shape_cast %59 : vector<1x1x128x128xbf16> to vector<128x128xbf16>
    %cst_53 = arith.constant dense<0.000000e+00> : vector<8x128xf32>
    %61 = tpu.matmul %4, %60, %cst_53 {dimension_numbers = #tpu.dot_dimension_numbers<[1], [0], [0], [1], [0, 0, 1, 1], [], []>} : vector<8x128xbf16>, vector<128x128xbf16>, vector<8x128xf32> -> vector<8x128xf32>
    %c0_54 = arith.constant 0 : index
    %c1_55 = arith.constant 1 : index
    %c0_56 = arith.constant 0 : index
    %c0_57 = arith.constant 0 : index
    %62 = vector.load %arg7[%c0_54, %c1_55, %c0_56, %c0_57] : memref<1x2x1x128xf32, #tpu.memory_space<vmem>>, vector<1x1x1x128xf32>
    %63 = vector.shape_cast %62 : vector<1x1x1x128xf32> to vector<1x128xf32>
    %64 = vector.broadcast %63 : vector<1x128xf32> to vector<8x128xf32>
    %65 = arith.addf %61, %64 : vector<8x128xf32>
    %c0_58 = arith.constant 0 : index
    %c1_59 = arith.constant 1 : index
    %c0_60 = arith.constant 0 : index
    %c0_61 = arith.constant 0 : index
    %66 = vector.load %arg8[%c0_58, %c1_59, %c0_60, %c0_61] : memref<1x2x128x128xbf16, #tpu.memory_space<vmem>>, vector<1x1x128x128xbf16>
    %67 = vector.shape_cast %66 : vector<1x1x128x128xbf16> to vector<128x128xbf16>
    %cst_62 = arith.constant dense<0.000000e+00> : vector<8x128xf32>
    %68 = tpu.matmul %4, %67, %cst_62 {dimension_numbers = #tpu.dot_dimension_numbers<[1], [0], [0], [1], [0, 0, 1, 1], [], []>} : vector<8x128xbf16>, vector<128x128xbf16>, vector<8x128xf32> -> vector<8x128xf32>
    %c0_63 = arith.constant 0 : index
    %c1_64 = arith.constant 1 : index
    %c0_65 = arith.constant 0 : index
    %c0_66 = arith.constant 0 : index
    %69 = vector.load %arg9[%c0_63, %c1_64, %c0_65, %c0_66] : memref<1x2x1x128xf32, #tpu.memory_space<vmem>>, vector<1x1x1x128xf32>
    %70 = vector.shape_cast %69 : vector<1x1x1x128xf32> to vector<1x128xf32>
    %71 = vector.broadcast %70 : vector<1x128xf32> to vector<8x128xf32>
    %72 = arith.addf %68, %71 : vector<8x128xf32>
    %73 = arith.truncf %58 : vector<8x128xf32> to vector<8x128xbf16>
    %74 = arith.truncf %65 : vector<8x128xf32> to vector<8x128xbf16>
    %cst_67 = arith.constant dense<0.000000e+00> : vector<8x8xf32>
    %75 = tpu.matmul %73, %74, %cst_67 {dimension_numbers = #tpu.dot_dimension_numbers<[1], [1], [0], [0], [0, 0, 1, 0], [], []>} : vector<8x128xbf16>, vector<8x128xbf16>, vector<8x8xf32> -> vector<8x8xf32>
    %76 = vector.broadcast %6 : vector<1x8xf32> to vector<8x8xf32>
    %77 = arith.addf %75, %76 : vector<8x8xf32>
    %cst_68 = arith.constant dense<0xFF800000> : vector<8xf32>
    %78 = vector.multi_reduction <maximumf>, %77, %cst_68 [1] : vector<8x8xf32> to vector<8xf32>
    %79 = vector.shape_cast %78 : vector<8xf32> to vector<8x1xf32>
    %80 = vector.broadcast %79 : vector<8x1xf32> to vector<8x8xf32>
    %81 = arith.subf %77, %80 : vector<8x8xf32>
    %82 = math.exp %81 : vector<8x8xf32>
    %cst_69 = arith.constant dense<0.000000e+00> : vector<8xf32>
    %83 = vector.multi_reduction <add>, %82, %cst_69 [1] : vector<8x8xf32> to vector<8xf32>
    %84 = vector.shape_cast %83 : vector<8xf32> to vector<8x1xf32>
    %85 = tpu.reciprocal %84 {approx = true} : vector<8x1xf32> -> vector<8x1xf32>
    %86 = vector.broadcast %85 : vector<8x1xf32> to vector<8x8xf32>
    %87 = arith.mulf %82, %86 : vector<8x8xf32>
    %88 = arith.truncf %87 : vector<8x8xf32> to vector<8x8xbf16>
    %89 = arith.truncf %72 : vector<8x128xf32> to vector<8x128xbf16>
    %cst_70 = arith.constant dense<0.000000e+00> : vector<8x128xf32>
    %90 = tpu.matmul %88, %89, %cst_70 {dimension_numbers = #tpu.dot_dimension_numbers<[1], [0], [0], [1], [0, 0, 1, 1], [], []>} : vector<8x8xbf16>, vector<8x128xbf16>, vector<8x128xf32> -> vector<8x128xf32>
    %91 = arith.truncf %90 : vector<8x128xf32> to vector<8x128xbf16>
    %c0_71 = arith.constant 0 : index
    %c1_72 = arith.constant 1 : index
    %c0_73 = arith.constant 0 : index
    %c0_74 = arith.constant 0 : index
    %92 = vector.load %arg10[%c0_71, %c1_72, %c0_73, %c0_74] : memref<1x2x128x128xbf16, #tpu.memory_space<vmem>>, vector<1x1x128x128xbf16>
    %93 = vector.shape_cast %92 : vector<1x1x128x128xbf16> to vector<128x128xbf16>
    %cst_75 = arith.constant dense<0.000000e+00> : vector<8x128xf32>
    %94 = tpu.matmul %91, %93, %cst_75 {dimension_numbers = #tpu.dot_dimension_numbers<[1], [0], [0], [1], [0, 0, 1, 1], [], []>} : vector<8x128xbf16>, vector<128x128xbf16>, vector<8x128xf32> -> vector<8x128xf32>
    %95 = arith.addf %51, %94 : vector<8x128xf32>
    %c0_76 = arith.constant 0 : index
    %c0_77 = arith.constant 0 : index
    %c0_78 = arith.constant 0 : index
    %96 = vector.load %arg11[%c0_76, %c0_77, %c0_78] : memref<1x1x128xf32, #tpu.memory_space<vmem>>, vector<1x1x128xf32>
    %97 = vector.shape_cast %96 : vector<1x1x128xf32> to vector<1x128xf32>
    %98 = vector.broadcast %97 : vector<1x128xf32> to vector<8x128xf32>
    %99 = arith.addf %95, %98 : vector<8x128xf32>
    %100 = arith.addf %99, %3 : vector<8x128xf32>
    %c0_79 = arith.constant 0 : index
    %c0_80 = arith.constant 0 : index
    %c0_81 = arith.constant 0 : index
    %101 = vector.load %arg12[%c0_79, %c0_80, %c0_81] : memref<1x1x128xf32, #tpu.memory_space<vmem>>, vector<1x1x128xf32>
    %102 = vector.shape_cast %101 : vector<1x1x128xf32> to vector<1x128xf32>
    %c0_82 = arith.constant 0 : index
    %c0_83 = arith.constant 0 : index
    %c0_84 = arith.constant 0 : index
    %103 = vector.load %arg13[%c0_82, %c0_83, %c0_84] : memref<1x1x128xf32, #tpu.memory_space<vmem>>, vector<1x1x128xf32>
    %104 = vector.shape_cast %103 : vector<1x1x128xf32> to vector<1x128xf32>
    %cst_85 = arith.constant dense<0.000000e+00> : vector<8xf32>
    %105 = vector.multi_reduction <add>, %100, %cst_85 [1] : vector<8x128xf32> to vector<8xf32>
    %106 = vector.shape_cast %105 : vector<8xf32> to vector<8x1xf32>
    %cst_86 = arith.constant 1.280000e+02 : f32
    %107 = vector.broadcast %cst_86 : f32 to vector<8x1xf32>
    %108 = arith.divf %106, %107 : vector<8x1xf32>
    %109 = vector.broadcast %108 : vector<8x1xf32> to vector<8x128xf32>
    %110 = arith.subf %100, %109 : vector<8x128xf32>
    %111 = arith.mulf %110, %110 : vector<8x128xf32>
    %cst_87 = arith.constant dense<0.000000e+00> : vector<8xf32>
    %112 = vector.multi_reduction <add>, %111, %cst_87 [1] : vector<8x128xf32> to vector<8xf32>
    %113 = vector.shape_cast %112 : vector<8xf32> to vector<8x1xf32>
    %cst_88 = arith.constant 1.280000e+02 : f32
    %114 = vector.broadcast %cst_88 : f32 to vector<8x1xf32>
    %115 = arith.divf %113, %114 : vector<8x1xf32>
    %cst_89 = arith.constant 9.99999996E-13 : f32
    %116 = vector.broadcast %cst_89 : f32 to vector<8x1xf32>
    %117 = arith.addf %115, %116 : vector<8x1xf32>
    %118 = math.rsqrt %117 : vector<8x1xf32>
    %119 = vector.broadcast %118 : vector<8x1xf32> to vector<8x128xf32>
    %120 = arith.mulf %110, %119 : vector<8x128xf32>
    %121 = vector.broadcast %102 : vector<1x128xf32> to vector<8x128xf32>
    %122 = arith.mulf %120, %121 : vector<8x128xf32>
    %123 = vector.broadcast %104 : vector<1x128xf32> to vector<8x128xf32>
    %124 = arith.addf %122, %123 : vector<8x128xf32>
    %125 = arith.truncf %124 : vector<8x128xf32> to vector<8x128xbf16>
    %c0_90 = arith.constant 0 : index
    %c0_91 = arith.constant 0 : index
    %c0_92 = arith.constant 0 : index
    %126 = vector.load %arg14[%c0_90, %c0_91, %c0_92] : memref<1x128x256xbf16, #tpu.memory_space<vmem>>, vector<1x128x256xbf16>
    %127 = vector.shape_cast %126 : vector<1x128x256xbf16> to vector<128x256xbf16>
    %cst_93 = arith.constant dense<0.000000e+00> : vector<8x256xf32>
    %128 = tpu.matmul %125, %127, %cst_93 {dimension_numbers = #tpu.dot_dimension_numbers<[1], [0], [0], [1], [0, 0, 1, 1], [], []>} : vector<8x128xbf16>, vector<128x256xbf16>, vector<8x256xf32> -> vector<8x256xf32>
    %c0_94 = arith.constant 0 : index
    %c0_95 = arith.constant 0 : index
    %c0_96 = arith.constant 0 : index
    %129 = vector.load %arg15[%c0_94, %c0_95, %c0_96] : memref<1x1x256xf32, #tpu.memory_space<vmem>>, vector<1x1x256xf32>
    %130 = vector.shape_cast %129 : vector<1x1x256xf32> to vector<1x256xf32>
    %131 = vector.broadcast %130 : vector<1x256xf32> to vector<8x256xf32>
    %132 = arith.addf %128, %131 : vector<8x256xf32>
    %cst_97 = arith.constant 5.000000e-01 : f32
    %133 = vector.broadcast %cst_97 : f32 to vector<8x256xf32>
    %134 = arith.mulf %133, %132 : vector<8x256xf32>
    %cst_98 = arith.constant 4.471500e-02 : f32
    %135 = vector.broadcast %cst_98 : f32 to vector<8x256xf32>
    %136 = arith.mulf %135, %132 : vector<8x256xf32>
    %137 = arith.mulf %136, %132 : vector<8x256xf32>
    %138 = arith.mulf %137, %132 : vector<8x256xf32>
    %139 = arith.addf %132, %138 : vector<8x256xf32>
    %cst_99 = arith.constant 0.797884583 : f32
    %140 = vector.broadcast %cst_99 : f32 to vector<8x256xf32>
    %141 = arith.mulf %140, %139 : vector<8x256xf32>
    %142 = math.tanh %141 : vector<8x256xf32>
    %cst_100 = arith.constant 1.000000e+00 : f32
    %143 = vector.broadcast %cst_100 : f32 to vector<8x256xf32>
    %144 = arith.addf %143, %142 : vector<8x256xf32>
    %145 = arith.mulf %134, %144 : vector<8x256xf32>
    %146 = arith.truncf %145 : vector<8x256xf32> to vector<8x256xbf16>
    %c0_101 = arith.constant 0 : index
    %c0_102 = arith.constant 0 : index
    %c0_103 = arith.constant 0 : index
    %147 = vector.load %arg16[%c0_101, %c0_102, %c0_103] : memref<1x256x128xbf16, #tpu.memory_space<vmem>>, vector<1x256x128xbf16>
    %148 = vector.shape_cast %147 : vector<1x256x128xbf16> to vector<256x128xbf16>
    %cst_104 = arith.constant dense<0.000000e+00> : vector<8x128xf32>
    %149 = tpu.matmul %146, %148, %cst_104 {dimension_numbers = #tpu.dot_dimension_numbers<[1], [0], [0], [1], [0, 0, 1, 1], [], []>} : vector<8x256xbf16>, vector<256x128xbf16>, vector<8x128xf32> -> vector<8x128xf32>
    %c0_105 = arith.constant 0 : index
    %c0_106 = arith.constant 0 : index
    %c0_107 = arith.constant 0 : index
    %150 = vector.load %arg17[%c0_105, %c0_106, %c0_107] : memref<1x1x128xf32, #tpu.memory_space<vmem>>, vector<1x1x128xf32>
    %151 = vector.shape_cast %150 : vector<1x1x128xf32> to vector<1x128xf32>
    %152 = vector.broadcast %151 : vector<1x128xf32> to vector<8x128xf32>
    %153 = arith.addf %149, %152 : vector<8x128xf32>
    %154 = arith.addf %153, %124 : vector<8x128xf32>
    %c0_108 = arith.constant 0 : index
    %c0_109 = arith.constant 0 : index
    %c0_110 = arith.constant 0 : index
    %155 = vector.load %arg18[%c0_108, %c0_109, %c0_110] : memref<1x1x128xf32, #tpu.memory_space<vmem>>, vector<1x1x128xf32>
    %156 = vector.shape_cast %155 : vector<1x1x128xf32> to vector<1x128xf32>
    %c0_111 = arith.constant 0 : index
    %c0_112 = arith.constant 0 : index
    %c0_113 = arith.constant 0 : index
    %157 = vector.load %arg19[%c0_111, %c0_112, %c0_113] : memref<1x1x128xf32, #tpu.memory_space<vmem>>, vector<1x1x128xf32>
    %158 = vector.shape_cast %157 : vector<1x1x128xf32> to vector<1x128xf32>
    %cst_114 = arith.constant dense<0.000000e+00> : vector<8xf32>
    %159 = vector.multi_reduction <add>, %154, %cst_114 [1] : vector<8x128xf32> to vector<8xf32>
    %160 = vector.shape_cast %159 : vector<8xf32> to vector<8x1xf32>
    %cst_115 = arith.constant 1.280000e+02 : f32
    %161 = vector.broadcast %cst_115 : f32 to vector<8x1xf32>
    %162 = arith.divf %160, %161 : vector<8x1xf32>
    %163 = vector.broadcast %162 : vector<8x1xf32> to vector<8x128xf32>
    %164 = arith.subf %154, %163 : vector<8x128xf32>
    %165 = arith.mulf %164, %164 : vector<8x128xf32>
    %cst_116 = arith.constant dense<0.000000e+00> : vector<8xf32>
    %166 = vector.multi_reduction <add>, %165, %cst_116 [1] : vector<8x128xf32> to vector<8xf32>
    %167 = vector.shape_cast %166 : vector<8xf32> to vector<8x1xf32>
    %cst_117 = arith.constant 1.280000e+02 : f32
    %168 = vector.broadcast %cst_117 : f32 to vector<8x1xf32>
    %169 = arith.divf %167, %168 : vector<8x1xf32>
    %cst_118 = arith.constant 9.99999996E-13 : f32
    %170 = vector.broadcast %cst_118 : f32 to vector<8x1xf32>
    %171 = arith.addf %169, %170 : vector<8x1xf32>
    %172 = math.rsqrt %171 : vector<8x1xf32>
    %173 = vector.broadcast %172 : vector<8x1xf32> to vector<8x128xf32>
    %174 = arith.mulf %164, %173 : vector<8x128xf32>
    %175 = vector.broadcast %156 : vector<1x128xf32> to vector<8x128xf32>
    %176 = arith.mulf %174, %175 : vector<8x128xf32>
    %177 = vector.broadcast %158 : vector<1x128xf32> to vector<8x128xf32>
    %178 = arith.addf %176, %177 : vector<8x128xf32>
    %c0_119 = arith.constant 0 : index
    %c0_120 = arith.constant 0 : index
    %179 = vector.load %arg21[%c0_119, %c0_120] : memref<8x128xf32, #tpu.memory_space<vmem>>, vector<8x128xf32>
    tpu.vector_store %arg21[%c0_119, %c0_120], %178 {strides = array<i32>} : memref<8x128xf32, #tpu.memory_space<vmem>>, vector<8x128xf32>,
    %c1_i32 = arith.constant 1 : i32
    %180 = arith.cmpi eq, %arg1, %c1_i32 : i32
    %181 = arith.extui %180 : i1 to i32
    %c0_i32_121 = arith.constant 0 : i32
    %182 = arith.cmpi ne, %181, %c0_i32_121 : i32
    scf.if %182 {
      %c0_122 = arith.constant 0 : index
      %c0_123 = arith.constant 0 : index
      %c0_124 = arith.constant 0 : index
      %183 = vector.load %arg20[%c0_122, %c0_123, %c0_124] : memref<1x8x128xf32, #tpu.memory_space<vmem>>, vector<1x8x128xf32>
      %184 = vector.shape_cast %183 : vector<1x8x128xf32> to vector<8x128xf32>
      %185 = vector.shape_cast %178 : vector<8x128xf32> to vector<1x8x128xf32>
      tpu.vector_store %arg20[%c0_122, %c0_123, %c0_124], %185 {strides = array<i32>} : memref<1x8x128xf32, #tpu.memory_space<vmem>>, vector<1x8x128xf32>,
    } else {
    }
    return
  }
  func.func @transform_0(%arg0: i32, %arg1: i32) -> (i32, i32, i32) {
    %c0_i32 = arith.constant 0 : i32
    %c0_i32_0 = arith.constant 0 : i32
    %c0_i32_1 = arith.constant 0 : i32
    return %arg0, %c0_i32, %c0_i32_0 : i32, i32, i32
  }
  func.func @transform_1(%arg0: i32, %arg1: i32) -> (i32, i32, i32) {
    %c0_i32 = arith.constant 0 : i32
    %c0_i32_0 = arith.constant 0 : i32
    %c0_i32_1 = arith.constant 0 : i32
    return %arg0, %c0_i32, %c0_i32_0 : i32, i32, i32
  }
  func.func @transform_2(%arg0: i32, %arg1: i32) -> (i32, i32, i32, i32) {
    %c0_i32 = arith.constant 0 : i32
    %c0_i32_0 = arith.constant 0 : i32
    %c0_i32_1 = arith.constant 0 : i32
    %c0_i32_2 = arith.constant 0 : i32
    return %arg1, %c0_i32, %c0_i32_0, %c0_i32_1 : i32, i32, i32, i32
  }
  func.func @transform_3(%arg0: i32, %arg1: i32) -> (i32, i32, i32, i32) {
    %c0_i32 = arith.constant 0 : i32
    %c0_i32_0 = arith.constant 0 : i32
    %c0_i32_1 = arith.constant 0 : i32
    %c0_i32_2 = arith.constant 0 : i32
    return %arg1, %c0_i32, %c0_i32_0, %c0_i32_1 : i32, i32, i32, i32
  }
  func.func @transform_4(%arg0: i32, %arg1: i32) -> (i32, i32, i32, i32) {
    %c0_i32 = arith.constant 0 : i32
    %c0_i32_0 = arith.constant 0 : i32
    %c0_i32_1 = arith.constant 0 : i32
    %c0_i32_2 = arith.constant 0 : i32
    return %arg1, %c0_i32, %c0_i32_0, %c0_i32_1 : i32, i32, i32, i32
  }
  func.func @transform_5(%arg0: i32, %arg1: i32) -> (i32, i32, i32, i32) {
    %c0_i32 = arith.constant 0 : i32
    %c0_i32_0 = arith.constant 0 : i32
    %c0_i32_1 = arith.constant 0 : i32
    %c0_i32_2 = arith.constant 0 : i32
    return %arg1, %c0_i32, %c0_i32_0, %c0_i32_1 : i32, i32, i32, i32
  }
  func.func @transform_6(%arg0: i32, %arg1: i32) -> (i32, i32, i32, i32) {
    %c0_i32 = arith.constant 0 : i32
    %c0_i32_0 = arith.constant 0 : i32
    %c0_i32_1 = arith.constant 0 : i32
    %c0_i32_2 = arith.constant 0 : i32
    return %arg1, %c0_i32, %c0_i32_0, %c0_i32_1 : i32, i32, i32, i32
  }
  func.func @transform_7(%arg0: i32, %arg1: i32) -> (i32, i32, i32, i32) {
    %c0_i32 = arith.constant 0 : i32
    %c0_i32_0 = arith.constant 0 : i32
    %c0_i32_1 = arith.constant 0 : i32
    %c0_i32_2 = arith.constant 0 : i32
    return %arg1, %c0_i32, %c0_i32_0, %c0_i32_1 : i32, i32, i32, i32
  }
  func.func @transform_8(%arg0: i32, %arg1: i32) -> (i32, i32, i32, i32) {
    %c0_i32 = arith.constant 0 : i32
    %c0_i32_0 = arith.constant 0 : i32
    %c0_i32_1 = arith.constant 0 : i32
    %c0_i32_2 = arith.constant 0 : i32
    return %arg1, %c0_i32, %c0_i32_0, %c0_i32_1 : i32, i32, i32, i32
  }
  func.func @transform_9(%arg0: i32, %arg1: i32) -> (i32, i32, i32) {
    %c0_i32 = arith.constant 0 : i32
    %c0_i32_0 = arith.constant 0 : i32
    %c0_i32_1 = arith.constant 0 : i32
    return %arg1, %c0_i32, %c0_i32_0 : i32, i32, i32
  }
  func.func @transform_10(%arg0: i32, %arg1: i32) -> (i32, i32, i32) {
    %c0_i32 = arith.constant 0 : i32
    %c0_i32_0 = arith.constant 0 : i32
    %c0_i32_1 = arith.constant 0 : i32
    return %arg1, %c0_i32, %c0_i32_0 : i32, i32, i32
  }
  func.func @transform_11(%arg0: i32, %arg1: i32) -> (i32, i32, i32) {
    %c0_i32 = arith.constant 0 : i32
    %c0_i32_0 = arith.constant 0 : i32
    %c0_i32_1 = arith.constant 0 : i32
    return %arg1, %c0_i32, %c0_i32_0 : i32, i32, i32
  }
  func.func @transform_12(%arg0: i32, %arg1: i32) -> (i32, i32, i32) {
    %c0_i32 = arith.constant 0 : i32
    %c0_i32_0 = arith.constant 0 : i32
    %c0_i32_1 = arith.constant 0 : i32
    return %arg1, %c0_i32, %c0_i32_0 : i32, i32, i32
  }
  func.func @transform_13(%arg0: i32, %arg1: i32) -> (i32, i32, i32) {
    %c0_i32 = arith.constant 0 : i32
    %c0_i32_0 = arith.constant 0 : i32
    %c0_i32_1 = arith.constant 0 : i32
    return %arg1, %c0_i32, %c0_i32_0 : i32, i32, i32
  }
  func.func @transform_14(%arg0: i32, %arg1: i32) -> (i32, i32, i32) {
    %c0_i32 = arith.constant 0 : i32
    %c0_i32_0 = arith.constant 0 : i32
    %c0_i32_1 = arith.constant 0 : i32
    return %arg1, %c0_i32, %c0_i32_0 : i32, i32, i32
  }
  func.func @transform_15(%arg0: i32, %arg1: i32) -> (i32, i32, i32) {
    %c0_i32 = arith.constant 0 : i32
    %c0_i32_0 = arith.constant 0 : i32
    %c0_i32_1 = arith.constant 0 : i32
    return %arg1, %c0_i32, %c0_i32_0 : i32, i32, i32
  }
  func.func @transform_16(%arg0: i32, %arg1: i32) -> (i32, i32, i32) {
    %c0_i32 = arith.constant 0 : i32
    %c0_i32_0 = arith.constant 0 : i32
    %c0_i32_1 = arith.constant 0 : i32
    return %arg1, %c0_i32, %c0_i32_0 : i32, i32, i32
  }
  func.func @transform_17(%arg0: i32, %arg1: i32) -> (i32, i32, i32) {
    %c0_i32 = arith.constant 0 : i32
    %c0_i32_0 = arith.constant 0 : i32
    %c0_i32_1 = arith.constant 0 : i32
    return %arg1, %c0_i32, %c0_i32_0 : i32, i32, i32
  }
  func.func @transform_18(%arg0: i32, %arg1: i32) -> (i32, i32, i32) {
    %c0_i32 = arith.constant 0 : i32
    %c0_i32_0 = arith.constant 0 : i32
    %c0_i32_1 = arith.constant 0 : i32
    return %arg0, %c0_i32, %c0_i32_0 : i32, i32, i32
  }
}

</mosaic_0001>

<bundles_post_ra>
// kernel: bert_classifier_forward.3
= control target key start
LH: loop header
LB: loop body
LE: loop exit
PB: predicated region body
PF: predicated region fallthrough
CT: control target
= control target key end

     0   :  { %s373_s18 = smov 0   ;;  %s402_s0 = inlined_call_operand.vmem [shape: f32[2,8,128], index: 0, kind: input, shape index: {}]   ;;  %s403_s1 = inlined_call_operand.vmem [shape: f32[8,128], index: 1, kind: input, shape index: {}]   ;;  %s404_s2 = inlined_call_operand.vmem [shape: f32[1,128], index: 2, kind: input, shape index: {}]   ;;  %s405_s3 = inlined_call_operand.vmem [shape: f32[1,128], index: 3, kind: input, shape index: {}]   ;;  %s406_s4 = inlined_call_operand.vmem [shape: f32[1,128], index: 4, kind: input, shape index: {}]   ;;  %s407_s5 = inlined_call_operand.vmem [shape: f32[2,8,128], index: 5, kind: output, shape index: {}]  }
   0x1 LB: > { %s313_s19 = sadd.s32 4294967295, %s341_s18   ;;  %p317_p0 = scmp.ge.s32.totalorder %s341_s18, 1  ;;  %s341_s18 = sphi %s373_s18, %s15_s18  }
   0x2   : > { %p186_p1 = scmp.lt.s32.totalorder %s341_s18, 3 }
   0x4   : > { %p187_p2 = pnand %p317_p0, %p186_p1 }
   0x5   : > { %p212_p3 = scmp.lt.s32.totalorder (!%p187_p2), %s313_s19, 1 }
   0x6   : > { %190 = sbr.rel (%p187_p2) target bundleno = 326 (0x146), region = 40 }
   0xb   : > { %s409_s19 = smov (!%p212_p3, %s313_s19), 1  ;;  %v221_v0 = vld [vmem:[%s403_s1] sm:$0xff] }
   0xc   : > { %s318_s20 = sshll.u32 %s409_s19, 3  ;;  %v320_v2 = vld [vmem:[%s404_s2] ss:$0 sm:$0xff] }
   0xd   : > { %s215_s25 = scalar_lea.vmem %s402_s0, %s318_s20  ;;  %v321_v13 = vld [vmem:[%s405_s3] ss:$0 sm:$0xff]  ;;  %s219_s9 = scalar_lea.vmem %s407_s5, %s318_s20 }
   0xe   : > { %v220_v1 = vld [vmem:[%s215_s25] sm:$0xff] }
   0xf   : > { %v222_v3 = vadd.f32 %v221_v0, %v220_v1  ;;  %v322_v15 = vld [vmem:[%s406_s4] ss:$0 sm:$0xff] }
  0x11   : > { %v230_v4 = vadd.f32 %v320_v2, %v222_v3 }
  0x13   : > { %233 = vadd.xlane.f32.xlu0 %v230_v4 }
  0x9c   : > { %v234_v5 = vpop.xlane.xlu0 %233 }
  0x9d   : > { %v236_v6 = vmul.f32 0.0078125, %v234_v5 }
  0x9f   : > { %v237_v7 = vsub.f32 %v230_v4, %v236_v6 }
  0xa1   : > { %v238_v8 = vmul.f32 %v237_v7, %v237_v7 }
  0xa3   : > { %239 = vadd.xlane.f32.xlu0 %v238_v8 }
 0x12c   : > { %v240_v9 = vpop.xlane.xlu0 %239 }
 0x12d   : > { %v241_v10 = vmul.f32 0.0078125, %v240_v9 }
 0x12f   : > { %v242_v11 = vadd.f32 1e-12, %v241_v10 }
 0x131   : > { %333 = vrsqrt.f32 %v242_v11 }
 0x13e   : > { %v334_v12 = vpop.eup %333 }
 0x13f   : > { %v244_v14 = vmul.f32 %v334_v12, %v237_v7 }
 0x141   : > { %v251_v16 = vmul.f32 %v321_v13, %v244_v14 }
 0x143   : > { %v258_v17 = vadd.f32 %v322_v15, %v251_v16 }
 0x145   : > { %259 = vst [vmem:[%s219_s9] sm:$0xff] %v258_v17 }
 0x146 PF: > { %s15_s18 = sadd.s32 1, %s341_s18  }
 0x147   : > { %p12_p4 = scmp.ge.s32.totalorder %s15_s18, 4  }
 0x149   :  { %14 = sbr.rel (!%p12_p4) target bundleno = 1 (0x1), region = 70 }

// kernel: bert_classifier_forward.5
= control target key start
LH: loop header
LB: loop body
LE: loop exit
PB: predicated region body
PF: predicated region fallthrough
CT: control target
= control target key end

     0   :  { %12 = vsyncpa [#allocation3], 0  ;;  %v963_v2 = vmov 0   ;;  %s1209_s0 = inlined_call_operand.vmem [shape: f32[2,128], index: 0, kind: input, shape index: {}]   ;;  %s1210_s1 = inlined_call_operand.vmem [shape: bf16[128,512], index: 1, kind: input, shape index: {}]   ;;  %s1211_s2 = inlined_call_operand.vmem [shape: f32[1,512], index: 2, kind: input, shape index: {}]   ;;  %s1212_s3 = inlined_call_operand.vmem [shape: bf16[512,128], index: 3, kind: input, shape index: {}]   ;;  %s1213_s4 = inlined_call_operand.vmem [shape: f32[1,128], index: 4, kind: input, shape index: {}]   ;;  %s1214_s5 = inlined_call_operand.hbm [shape: f32[2,512], index: 5, kind: output, shape index: {0}]   ;;  %s1215_s6 = inlined_call_operand.hbm [shape: f32[2,128], index: 6, kind: output, shape index: {1}]  }
   0x1   :  { %v839_v0 = vld [vmem:[%s1210_s1 + $0xe4] ss:$16 sps:$4 sm:$0xff]   ;;  %v841_v1 = vld [vmem:[%s1210_s1 + $0xec] ss:$16 sps:$4 sm:$0xff]   ;;  %273 = vmatprep.mubr.bf16.mxu0 %v963_v2  ;;  %314 = vmatprep.mubr.bf16.mxu1 %v963_v2  ;;  %v843_v3 = vld [vmem:[%s1210_s1 + $0xe0] ss:$16 sps:$4 sm:$0xff]  }
   0x2   :  { %241 = vmatprep.subr.bf16.mxu0 %v839_v0  ;;  %v844_v4 = vld [vmem:[%s1210_s1 + $0xe8] ss:$16 sps:$4 sm:$0xff]   ;;  %282 = vmatprep.subr.bf16.mxu1 %v841_v1  ;;  %v845_v5 = vld [vmem:[%s1210_s1 + $0xc4] ss:$16 sps:$4 sm:$0xff]   ;;  %v847_v6 = vld [vmem:[%s1210_s1 + $0xcc] ss:$16 sps:$4 sm:$0xff]  }
   0x3   :  { %242 = vmatpush1.bf16.msra.mxu0 %v843_v3  ;;  %283 = vmatpush1.bf16.msra.mxu1 %v844_v4  ;;  %v849_v7 = vld [vmem:[%s1210_s1 + $0xc0] ss:$16 sps:$4 sm:$0xff]   ;;  %v850_v8 = vld [vmem:[%s1210_s1 + $0xc8] ss:$16 sps:$4 sm:$0xff]   ;;  %v851_v9 = vld [vmem:[%s1210_s1 + $0xa4] ss:$16 sps:$4 sm:$0xff]  }
   0x4   :  { %243 = vmatprep.subr.bf16.mxu0 %v845_v5  ;;  %284 = vmatprep.subr.bf16.mxu1 %v847_v6  ;;  %v853_v10 = vld [vmem:[%s1210_s1 + $0xac] ss:$16 sps:$4 sm:$0xff]   ;;  %v855_v11 = vld [vmem:[%s1210_s1 + $0xa0] ss:$16 sps:$4 sm:$0xff]   ;;  %v856_v12 = vld [vmem:[%s1210_s1 + $0xa8] ss:$16 sps:$4 sm:$0xff]  }
   0x5   :  { %v857_v13 = vld [vmem:[%s1210_s1 + $0x84] ss:$16 sps:$4 sm:$0xff]   ;;  %v859_v14 = vld [vmem:[%s1210_s1 + $0x8c] ss:$16 sps:$4 sm:$0xff]   ;;  %v861_v15 = vld [vmem:[%s1210_s1 + $0x80] ss:$16 sps:$4 sm:$0xff]  }
   0x6   :  { %v862_v16 = vld [vmem:[%s1210_s1 + $0x88] ss:$16 sps:$4 sm:$0xff]   ;;  %v863_v17 = vld [vmem:[%s1210_s1 + $0x64] ss:$16 sps:$4 sm:$0xff]   ;;  %v865_v18 = vld [vmem:[%s1210_s1 + $0x6c] ss:$16 sps:$4 sm:$0xff]  }
   0x7   :  { %244 = vmatpush1.bf16.msra.mxu0 %v849_v7  ;;  %285 = vmatpush1.bf16.msra.mxu1 %v850_v8  ;;  %v867_v19 = vld [vmem:[%s1210_s1 + $0x60] ss:$16 sps:$4 sm:$0xff]   ;;  %v868_v20 = vld [vmem:[%s1210_s1 + $0x68] ss:$16 sps:$4 sm:$0xff]   ;;  %v869_v21 = vld [vmem:[%s1210_s1 + $0x44] ss:$16 sps:$4 sm:$0xff]  }
   0x8   :  { %245 = vmatprep.subr.bf16.mxu0 %v851_v9  ;;  %286 = vmatprep.subr.bf16.mxu1 %v853_v10  ;;  %v871_v22 = vld [vmem:[%s1210_s1 + $0x4c] ss:$16 sps:$4 sm:$0xff]   ;;  %v873_v23 = vld [vmem:[%s1210_s1 + $0x40] ss:$16 sps:$4 sm:$0xff]   ;;  %v874_v24 = vld [vmem:[%s1210_s1 + $0x48] ss:$16 sps:$4 sm:$0xff]  }
   0x9   :  { %v875_v25 = vld [vmem:[%s1210_s1 + $0x24] ss:$16 sps:$4 sm:$0xff]   ;;  %v877_v26 = vld [vmem:[%s1210_s1 + $0x2c] ss:$16 sps:$4 sm:$0xff]   ;;  %v879_v27 = vld [vmem:[%s1210_s1 + $0x20] ss:$16 sps:$4 sm:$0xff]  }
   0xa   :  { %v880_v28 = vld [vmem:[%s1210_s1 + $0x28] ss:$16 sps:$4 sm:$0xff]   ;;  %v881_v29 = vld [vmem:[%s1210_s1 + $0x4] ss:$16 sps:$4 sm:$0xff]   ;;  %v883_v30 = vld [vmem:[%s1210_s1 + $0xc] ss:$16 sps:$4 sm:$0xff]  }
   0xb   :  { %246 = vmatpush1.bf16.msra.mxu0 %v855_v11  ;;  %287 = vmatpush1.bf16.msra.mxu1 %v856_v12  ;;  %v885_v31 = vld [vmem:[%s1210_s1] ss:$16 sps:$4 sm:$0xff]   ;;  %v886_v32 = vld [vmem:[%s1210_s1 + $0x8] ss:$16 sps:$4 sm:$0xff]  }
   0xc   :  { %247 = vmatprep.subr.bf16.mxu0 %v857_v13  ;;  %288 = vmatprep.subr.bf16.mxu1 %v859_v14  ;;  %v25_v33 = vld [vmem:[%s1209_s0] sm:$0x3]  ;;  %v887_v34 = vld [vmem:[%s1212_s3 + $0x78] sm:$0xff]   ;;  %v891_v39 = vld [vmem:[%s1212_s3 + $0x70] sm:$0xff]  }
   0xd   :  { %v888_v35 = vld [vmem:[%s1212_s3 + $0xf8] sm:$0xff]   ;;  %v26_v37 = vpack.c.bf16 %v25_v33, %v25_v33  ;;  %v892_v40 = vld [vmem:[%s1212_s3 + $0xf0] sm:$0xff]   ;;  %v895_v43 = vld [vmem:[%s1212_s3 + $0x68] sm:$0xff]  }
   0xe   :  { %v889_v36 = vld [vmem:[%s1212_s3 + $0x38] sm:$0xff]   ;;  %v893_v41 = vld [vmem:[%s1212_s3 + $0x30] sm:$0xff]   ;;  %v896_v44 = vld [vmem:[%s1212_s3 + $0xe8] sm:$0xff]  }
   0xf   :  { %248 = vmatpush1.bf16.msra.mxu0 %v861_v15  ;;  %289 = vmatpush1.bf16.msra.mxu1 %v862_v16  ;;  %v890_v38 = vld [vmem:[%s1212_s3 + $0xb8] sm:$0xff]   ;;  %v894_v42 = vld [vmem:[%s1212_s3 + $0xb0] sm:$0xff]   ;;  %v897_v45 = vld [vmem:[%s1212_s3 + $0x28] sm:$0xff]  }
  0x10   :  { %249 = vmatprep.subr.bf16.mxu0 %v863_v17  ;;  %290 = vmatprep.subr.bf16.mxu1 %v865_v18  ;;  %v898_v46 = vld [vmem:[%s1212_s3 + $0xa8] sm:$0xff]   ;;  %v899_v47 = vld [vmem:[%s1212_s3 + $0x60] sm:$0xff]   ;;  %v903_v51 = vld [vmem:[%s1212_s3 + $0x58] sm:$0xff]  }
  0x11   :  { %v900_v48 = vld [vmem:[%s1212_s3 + $0xe0] sm:$0xff]   ;;  %v904_v52 = vld [vmem:[%s1212_s3 + $0xd8] sm:$0xff]   ;;  %v907_v55 = vld [vmem:[%s1212_s3 + $0x50] sm:$0xff]  }
  0x12   :  { %v901_v49 = vld [vmem:[%s1212_s3 + $0x20] sm:$0xff]   ;;  %v905_v53 = vld [vmem:[%s1212_s3 + $0x18] sm:$0xff]   ;;  %v908_v56 = vld [vmem:[%s1212_s3 + $0xd0] sm:$0xff]  }
  0x13   :  { %250 = vmatpush1.bf16.msra.mxu0 %v867_v19  ;;  %291 = vmatpush1.bf16.msra.mxu1 %v868_v20  ;;  %v902_v50 = vld [vmem:[%s1212_s3 + $0xa0] sm:$0xff]   ;;  %v906_v54 = vld [vmem:[%s1212_s3 + $0x98] sm:$0xff]  }
  0x14   :  { %251 = vmatprep.subr.bf16.mxu0 %v869_v21  ;;  %292 = vmatprep.subr.bf16.mxu1 %v871_v22 }
  0x17   :  { %252 = vmatpush1.bf16.msra.mxu0 %v873_v23  ;;  %293 = vmatpush1.bf16.msra.mxu1 %v874_v24 }
  0x18   :  { %253 = vmatprep.subr.bf16.mxu0 %v875_v25  ;;  %294 = vmatprep.subr.bf16.mxu1 %v877_v26 }
  0x1b   :  { %254 = vmatpush1.bf16.msra.mxu0 %v879_v27  ;;  %295 = vmatpush1.bf16.msra.mxu1 %v880_v28 }
  0x1c   :  { %255 = vmatprep.subr.bf16.mxu0 %v881_v29  ;;  %296 = vmatprep.subr.bf16.mxu1 %v883_v30 }
  0x1f   :  { %256 = vmatpush1.bf16.msra.mxu0 %v885_v31  ;;  %297 = vmatpush1.bf16.msra.mxu1 %v886_v32 }
  0x20   :  { %791 = vmatprep.subr.bf16.mxu0 %v887_v34  ;;  %813 = vmatprep.subr.bf16.mxu1 %v888_v35 }
  0x22   :  { %274 = vmatmul.mubr.bf16.vlgmr.msra.gmra.mxu0 %v26_v37  ;;  %315 = vmatmul.mubr.bf16.vlgmr.msra.gmra.mxu1 %v26_v37 }
  0x23   :  { %792 = vmatpush3.bf16.msra.mxu0 %v889_v36  ;;  %814 = vmatpush3.bf16.msra.mxu1 %v890_v38 }
  0x24   :  { %793 = vmatprep.subr.bf16.mxu0 %v891_v39  ;;  %815 = vmatprep.subr.bf16.mxu1 %v892_v40 }
  0x27   :  { %794 = vmatpush3.bf16.msra.mxu0 %v893_v41  ;;  %816 = vmatpush3.bf16.msra.mxu1 %v894_v42 }
  0x28   :  { %795 = vmatprep.subr.bf16.mxu0 %v895_v43  ;;  %817 = vmatprep.subr.bf16.mxu1 %v896_v44 }
  0x2b   :  { %796 = vmatpush3.bf16.msra.mxu0 %v897_v45  ;;  %818 = vmatpush3.bf16.msra.mxu1 %v898_v46 }
  0x2c   :  { %797 = vmatprep.subr.bf16.mxu0 %v899_v47  ;;  %819 = vmatprep.subr.bf16.mxu1 %v900_v48 }
  0x2f   :  { %798 = vmatpush3.bf16.msra.mxu0 %v901_v49  ;;  %820 = vmatpush3.bf16.msra.mxu1 %v902_v50 }
  0x30   :  { %799 = vmatprep.subr.bf16.mxu0 %v903_v51  ;;  %821 = vmatprep.subr.bf16.mxu1 %v904_v52 }
  0x31   :  { %13 = vsyncpa [#allocation5], 0  ;;  %v909_v57 = vld [vmem:[%s1212_s3 + $0x10] sm:$0xff]   ;;  %v911_v59 = vld [vmem:[%s1212_s3 + $0x48] sm:$0xff]   ;;  %v61_v3 = vlaneseq  ;;  %v964_v12 = vmov 1983009808  }
  0x32   :  { %v910_v58 = vld [vmem:[%s1212_s3 + $0x90] sm:$0xff]   ;;  %v912_v60 = vld [vmem:[%s1212_s3 + $0xc8] sm:$0xff]   ;;  %v915_v63 = vld [vmem:[%s1212_s3 + $0x40] sm:$0xff]   ;;  %v334_v13 = vunpack.c.l.s4 %v964_v12 }
  0x33   :  { %800 = vmatpush3.bf16.msra.mxu0 %v905_v53  ;;  %822 = vmatpush3.bf16.msra.mxu1 %v906_v54  ;;  %v913_v61 = vld [vmem:[%s1212_s3 + $0x8] sm:$0xff]   ;;  %v916_v0 = vld [vmem:[%s1212_s3 + $0xc0] sm:$0xff]   ;;  %v62_v4 = vshrl.u32 %v61_v3, 7 }
  0x34   :  { %801 = vmatprep.subr.bf16.mxu0 %v907_v55  ;;  %823 = vmatprep.subr.bf16.mxu1 %v908_v56  ;;  %v914_v62 = vld [vmem:[%s1212_s3 + $0x88] sm:$0xff]   ;;  %v917_v1 = vld [vmem:[%s1212_s3] sm:$0xff]   ;;  %v335_v20 = vunpack.c.0.s8 %v334_v13 }
  0x35   :  { %v918_v2 = vld [vmem:[%s1212_s3 + $0x80] sm:$0xff]   ;;  %v63_v5 = vsub.s32 0, %v62_v4  ;;  %v71_v6 = vsub.s32 2, %v62_v4  ;;  %v67_v8 = vsub.s32 1, %v62_v4  ;;  %v75_v9 = vsub.s32 3, %v62_v4 }
  0x36   :  { %v59_v7 = vld [vmem:[%s1211_s2] sm:$0xf]  ;;  %v338_v31 = vsub.s32 %v335_v20, %v62_v4  ;;  %s965_s2 = smov [#allocation2]  }
  0x37   :  { %802 = vmatpush3.bf16.msra.mxu0 %v909_v57  ;;  %824 = vmatpush3.bf16.msra.mxu1 %v910_v58  ;;  %v64_v10 = vrot.slane %v59_v7, %v63_v5  ;;  %v72_v11 = vrot.slane %v59_v7, %v71_v6  ;;  %v68_v14 = vrot.slane %v59_v7, %v67_v8  ;;  %s704_s3 = sshll.u32 %s965_s2, 4  ;;  %s705_s3 = int_to_ptr.vmem [resolvable:$true] %s704_s3 }
  0x38   :  { %803 = vmatprep.subr.bf16.mxu0 %v911_v59  ;;  %825 = vmatprep.subr.bf16.mxu1 %v912_v60  ;;  %v76_v15 = vrot.slane %v59_v7, %v75_v9  ;;  %s919_s27 = scalar_lea.vmem %s705_s3, 128  ;;  %p924_p1 = scmp.lt.s32.totalorder %s705_s3, %s705_s3 }
  0x39   :  { %p920_p0 = scmp.ne.s32.totalorder %s705_s3, %s919_s27  ;;  %p925_p2 = scmp.lt.s32.totalorder %s919_s27, %s919_s27 }
  0x3b   :  { %804 = vmatpush3.bf16.msra.mxu0 %v913_v61  ;;  %826 = vmatpush3.bf16.msra.mxu1 %v914_v62  ;;  %p926_p3 = por %p925_p2, %p924_p1 }
  0x3c   :  { %805 = vmatprep.subr.bf16.mxu0 %v915_v63  ;;  %827 = vmatprep.subr.bf16.mxu1 %v916_v0 }
  0x3d   :  { %p927_p4 = pnand %p926_p3, %p920_p0 }
  0x3f   :  { %806 = vmatpush3.bf16.msra.mxu0 %v917_v1  ;;  %828 = vmatpush3.bf16.msra.mxu1 %v918_v2 }
  0xe2   :  { %v275_v16 = vpop.f32.mrf.mxu0  ;;  %v316_v17 = vpop.f32.mrf.mxu1 }
  0xe3   :  { %v276_v18 = vadd.f32 %v275_v16, %v64_v10  ;;  %v317_v19 = vadd.f32 %v316_v17, %v72_v11 }
  0xe4   :  { %v277_v21 = vpop.f32.mrf.mxu0  ;;  %v318_v22 = vpop.f32.mrf.mxu1 }
  0xe5   :  { %v325_v23 = vmax.f32 %v317_v19, 0.0  ;;  %v278_v24 = vadd.f32 %v277_v21, %v68_v14  ;;  %v319_v25 = vadd.f32 %v318_v22, %v76_v15  ;;  %v323_v26 = vmax.f32 %v276_v18, 0.0 }
  0xe6   :  { %v279_v27 = vpop.f32.mrf.mxu0  ;;  %v320_v28 = vpop.f32.mrf.mxu1 }
  0xe7   :  { %v324_v29 = vmax.f32 %v278_v24, 0.0  ;;  %v326_v30 = vmax.f32 %v319_v25, 0.0  ;;  %v352_v32 = vpack.c.bf16 %v325_v23, %v325_v23  ;;  %v350_v39 = vpack.c.bf16 %v323_v26, %v323_v26 }
  0xe8   :  { %v280_v33 = vpop.f32.mrf.mxu0  ;;  %v321_v34 = vpop.f32.mrf.mxu1 }
  0xe9   :  { %v331_v35 = vcombine.low %v323_v26, %v324_v29  ;;  %v351_v36 = vpack.c.bf16 %v324_v29, %v324_v29  ;;  %v332_v37 = vcombine.low %v325_v23, %v326_v30  ;;  %v353_v38 = vpack.c.bf16 %v326_v30, %v326_v30 }
  0xeb   :  { %649 = vmatprep.mubr.bf16.mxu0 %v351_v36  ;;  %689 = vmatprep.mubr.bf16.mxu1 %v353_v38  ;;  %v339_v40 = vrot.slane %v331_v35, %v338_v31  ;;  %v346_v41 = vrot.slane %v332_v37, %v338_v31 }
  0xec   :  { %650 = vmatmul.mubr.bf16.vlgmr.msra.gmra.mxu0 %v350_v39  ;;  %690 = vmatmul.mubr.bf16.vlgmr.msra.gmra.mxu1 %v352_v32 }
  0xed   :  { %v347_v42 = vcombine.low %v339_v40, %v346_v41 }
  0xef   :  { %349 = vst [vmem:[#allocation2] sm:$0xff] %v347_v42 }
  0xf0   :  { %930 = shalt.err (!%p927_p4)
}
  0xf1   :  { %707 = dma.vmem_to_hbm [thread:$0]  %s705_s3, 128, %s1214_s5, [#allocation3]   ;;  %v758_v45 = vld [vmem:[%s1213_s4] ss:$0 sm:$0xff] }
  0xf2   :  { %s966_s8 = smov [#allocation4]  }
  0xf3   :  { %s714_s9 = sshll.u32 %s966_s8, 4  ;;  %s715_s9 = int_to_ptr.vmem [resolvable:$true] %s714_s9 }
  0xf4   :  { %s939_s5 = scalar_lea.vmem %s715_s9, 32  ;;  %p944_p6 = scmp.lt.s32.totalorder %s715_s9, %s715_s9 }
  0xf5   :  { %p940_p5 = scmp.ne.s32.totalorder %s715_s9, %s939_s5  ;;  %p945_p7 = scmp.lt.s32.totalorder %s939_s5, %s939_s5 }
  0xf7   :  { %p946_p8 = por %p945_p7, %p944_p6 }
  0xf9   :  { %p947_p9 = pnand %p946_p8, %p940_p5 }
 0x1ac   :  { %v807_v43 = vpop.f32.mrf.mxu0  ;;  %v829_v44 = vpop.f32.mrf.mxu1 }
 0x1ae   :  { %v808_v46 = vpop.f32.mrf.mxu0  ;;  %v830_v47 = vpop.f32.mrf.mxu1 }
 0x1af   :  { %v809_v48 = vadd.f32 %v808_v46, %v807_v43  ;;  %v831_v52 = vadd.f32 %v830_v47, %v829_v44 }
 0x1b0   :  { %v810_v49 = vpop.f32.mrf.mxu0  ;;  %v832_v50 = vpop.f32.mrf.mxu1 }
 0x1b1   :  { %v652_v51 = vadd.f32 %v809_v48, %v758_v45 }
 0x1b2   :  { %v811_v53 = vpop.f32.mrf.mxu0  ;;  %v833_v54 = vpop.f32.mrf.mxu1 }
 0x1b3   :  { %v692_v55 = vadd.f32 %v831_v52, %v652_v51 }
 0x1b5   :  { %697 = vst [vmem:[#allocation4] sm:$0x3] %v692_v55 }
 0x1b6   :  { %950 = shalt.err (!%p947_p9)
}
 0x1b7   :  { %717 = dma.vmem_to_hbm [thread:$0]  %s715_s9, 32, %s1215_s6, [#allocation5]  }
 0x1b8   :  { %959 = dma.done.wait [#allocation3], 128  }
 0x1b9   :  { %960 = vsyncadd [#allocation3], 4294967168 }
 0x1ba   :  { %961 = dma.done.wait [#allocation5], 32  }
 0x1bb   :  { %962 = vsyncadd [#allocation5], 4294967264 }
 0x1bc   :  { %724 = vsyncpa [#allocation3], 1 }
 0x1bd   :  { %725 = vsyncpa [#allocation5], 1 }

// kernel: bert_classifier_forward.4
= control target key start
LH: loop header
LB: loop body
LE: loop exit
PB: predicated region body
PF: predicated region fallthrough
CT: control target
= control target key end

     0   :  { %s4399_s0 = inlined_call_operand.vmem [shape: f32[2,8,128], index: 0, kind: input, shape index: {}]   ;;  %s4400_s1 = inlined_call_operand.vmem [shape: f32[2,1,8], index: 1, kind: input, shape index: {}]   ;;  %s4401_s2 = inlined_call_operand.vmem [shape: bf16[2,2,128,128], index: 2, kind: input, shape index: {}]   ;;  %s4402_s3 = inlined_call_operand.vmem [shape: f32[2,2,1,128], index: 3, kind: input, shape index: {}]   ;;  %s4403_s4 = inlined_call_operand.hbm [shape: bf16[2,2,128,128], index: 4, kind: input, shape index: {}]   ;;  %s4404_s5 = inlined_call_operand.vmem [shape: f32[2,2,1,128], index: 5, kind: input, shape index: {}]   ;;  %s4405_s6 = inlined_call_operand.hbm [shape: bf16[2,2,128,128], index: 6, kind: input, shape index: {}]   ;;  %s4406_s7 = inlined_call_operand.vmem [shape: f32[2,2,1,128], index: 7, kind: input, shape index: {}]   ;;  %s4407_s8 = inlined_call_operand.hbm [shape: bf16[2,2,128,128], index: 8, kind: input, shape index: {}]   ;;  %s4408_s9 = inlined_call_operand.vmem [shape: f32[2,1,128], index: 9, kind: input, shape index: {}]   ;;  %s4409_s10 = inlined_call_operand.vmem [shape: f32[2,1,128], index: 10, kind: input, shape index: {}]   ;;  %s4410_s11 = inlined_call_operand.vmem [shape: f32[2,1,128], index: 11, kind: input, shape index: {}]   ;;  %s4411_s12 = inlined_call_operand.hbm [shape: bf16[2,128,256], index: 12, kind: input, shape index: {}]   ;;  %s4412_s13 = inlined_call_operand.vmem [shape: f32[2,1,256], index: 13, kind: input, shape index: {}]   ;;  %s4413_s14 = inlined_call_operand.hbm [shape: bf16[2,256,128], index: 14, kind: input, shape index: {}]   ;;  %s4414_s15 = inlined_call_operand.vmem [shape: f32[2,1,128], index: 15, kind: input, shape index: {}]   ;;  %s4415_s16 = inlined_call_operand.vmem [shape: f32[2,1,128], index: 16, kind: input, shape index: {}]   ;;  %s4416_s17 = inlined_call_operand.vmem [shape: f32[2,1,128], index: 17, kind: input, shape index: {}]   ;;  %s4417_s18 = inlined_call_operand.vmem [shape: f32[2,8,128], index: 18, kind: output, shape index: {}]  }
   0x1   :  { %4438 = sst [smem:[#allocation29_spill]] %s4399_s0 }
   0x2   :  { %4439 = sst [smem:[#allocation30_spill]] %s4400_s1 }
   0x3   :  { %4440 = sst [smem:[#allocation31_spill]] %s4401_s2 }
   0x4   :  { %4441 = sst [smem:[#allocation32_spill]] %s4402_s3 }
   0x5   :  { %4442 = sst [smem:[#allocation33_spill]] %s4403_s4 }
   0x6   :  { %4443 = sst [smem:[#allocation34_spill]] %s4404_s5 }
   0x7   :  { %4444 = sst [smem:[#allocation35_spill]] %s4405_s6 }
   0x8   :  { %4445 = sst [smem:[#allocation36_spill]] %s4406_s7 }
   0x9   :  { %4446 = sst [smem:[#allocation37_spill]] %s4407_s8 }
   0xa   :  { %4447 = sst [smem:[#allocation38_spill]] %s4408_s9 }
   0xb   :  { %4448 = sst [smem:[#allocation39_spill]] %s4409_s10 }
   0xc   :  { %4449 = sst [smem:[#allocation40_spill]] %s4410_s11 }
   0xd   :  { %4450 = sst [smem:[#allocation41_spill]] %s4411_s12 }
   0xe   :  { %4451 = sst [smem:[#allocation42_spill]] %s4412_s13 }
   0xf   :  { %4452 = sst [smem:[#allocation43_spill]] %s4413_s14 }
  0x10   :  { %4453 = sst [smem:[#allocation44_spill]] %s4414_s15 }
  0x11   :  { %4454 = sst [smem:[#allocation45_spill]] %s4415_s16 }
  0x12   :  { %4455 = sst [smem:[#allocation46_spill]] %s4416_s17 }
  0x13   :  { %4456 = sst [smem:[#allocation47_spill]] %s4417_s18 }
  0x14   :  { %23 = vsyncpa [#allocation4], 0 }
  0x15   :  { %25 = vsyncpa [#allocation4 + $0x1], 0 }
  0x16   :  { %26 = vsyncpa [#allocation6], 0 }
  0x17   :  { %28 = vsyncpa [#allocation6 + $0x1], 0 }
  0x18   :  { %29 = vsyncpa [#allocation9], 0 }
  0x19   :  { %31 = vsyncpa [#allocation9 + $0x1], 0  ;;  %s3827_s27 = smov 0   ;;  %s3829_s28 = smov 0  }
  0x1a   :  { %s3831_s29 = smov 0   ;;  %s3833_s30 = smov 0  }
  0x1b   :  { %s3835_s0 = smov 0   ;;  %s3837_s19 = smov 0  }
  0x1c   :  { %s3839_s1 = smov 0   ;;  %s3841_s20 = smov 0  }
  0x1d LB: > { %4457 = sst [smem:[#allocation14_spill]] %s3694_s28  ;;  %s4419_s21 = sadd.s32 4294967295, %s3718_s20   ;;  %s3718_s20 = sphi %s3841_s20, %s37_s20   ;;  %s3714_s1 = sphi %s3839_s1, %s4526_s1   ;;  %s3710_s19 = sphi %s3837_s19, %s4525_s19   ;;  %s3706_s0 = sphi %s3835_s0, %s4524_s0   ;;  %s3702_s30 = sphi %s3833_s30, %s4523_s30   ;;  %s3698_s29 = sphi %s3831_s29, %s4522_s29   ;;  %s3694_s28 = sphi %s3829_s28, %s4521_s28   ;;  %s3690_s27 = sphi %s3827_s27, %s4520_s27  }
  0x1e   : > { %4458 = sst [smem:[#allocation15_spill]] %s3698_s29  ;;  %s46_s22 = sadd.s32 1, %s3710_s19 }
  0x1f   : > { %4459 = sst [smem:[#allocation16_spill]] %s3702_s30  ;;  %p47_p0 = scmp.ge.s32.totalorder %s46_s22, 2 }
  0x20   : > { %4460 = sst [smem:[#allocation17_spill]] %s3710_s19  ;;  %s49_s2 = sadd.s32 1, %s3714_s1 }
  0x21   : > { %4461 = sst [smem:[#allocation18_spill]] %s3714_s1  ;;  %s160_s23 = sadd.s32 1, %s3698_s29 }
  0x22   : > { %4462 = sst [smem:[#allocation19_spill]] %s3718_s20  ;;  %p167_p1 = scmp.ne.s32.totalorder %s3698_s29, %s3694_s28 }
  0x23   : > { %s4528_s22 = smov (%p47_p0, %s46_s22), 0  ;;  %s4530_s2 = smov (!%p47_p0, %s49_s2), %s3714_s1 }
  0x24   : > { %4463 = sst [smem:[#allocation20_spill]] %s4528_s22  ;;  %s157_s24 = ssub.s32 %s3710_s19, %s4528_s22 }
  0x25   : > { %p168_p2 = scmp.eq.s32.totalorder %s3718_s20, 0  ;;  %p51_p3 = scmp.ge.s32.totalorder %s4530_s2, 2 }
  0x26   : > { %p158_p4 = scmp.eq.s32.totalorder %s157_s24, 0  ;;  %p173_p6 = scmp.ne.s32.totalorder %s3694_s28, %s3690_s27 }
  0x27   : > { %p169_p5 = por %p168_p2, %p167_p1  ;;  %s4532_s2 = smov (%p51_p3, %s4530_s2), 0 }
  0x28   : > { %4464 = sst [smem:[#allocation21_spill]] %s4532_s2  ;;  %p174_p7 = scmp.eq.s32.totalorder %s4419_s21, 0 }
  0x29   : > { %s3881_s25 = scalar_select %p158_p4, %s3698_s29, %s160_s23  }
  0x2a   : > { %p3312_p8 = scmp.lt.s32.totalorder %s3718_s20, 4  ;;  %s4421_s26 = sand.u32 1, %s3698_s29  }
  0x2b   : > { %4465 = sst [smem:[#allocation22_spill]] %s3881_s25  ;;  %p3887_p9 = por %p174_p7, %p173_p6 }
  0x2c   : > { %s3893_s22 = sshll.u32 %s4421_s26, 7  ;;  %s3896_s24 = sshll.u32 %s3710_s19, 11 }
  0x2d   : > { %p3898_p10 = pnand %p3312_p8, %p169_p5  ;;  %s4423_s23 = sand.u32 1, %s3718_s20  }
  0x2e   : > { %s4468_s6 = sld [smem:[#allocation35_spill]]  ;;  %s621_s25 = scalar_lea.vmem [#allocation5], %s3893_s22 }
  0x2f   : > { %s628_s17 = sshll.u32 %s621_s25, 4  ;;  %p2798_p11 = scmp.ge.s32.totalorder %s3718_s20, 1  ;;  %s629_s17 = int_to_ptr.vmem [resolvable:$true] %s628_s17 }
  0x30   : > { %s3911_s26 = scalar_lea.sflag [#allocation6], %s4423_s23  ;;  %p3915_p12 = pneg %p3898_p10 }
  0x31   : > { %s3517_s16 = scalar_lea.vmem %s629_s17, 2048  ;;  %s3720_s21 = smov [#allocation5]  }
  0x32   : > { %p3518_p13 = scmp.ne.s32.totalorder %s629_s17, %s3517_s16  ;;  %s3522_s2 = sshll.u32 %s3720_s21, 4  ;;  %s3523_s2 = int_to_ptr.vmem [resolvable:$false] %s3522_s2 }
  0x33   : > { %s3524_s25 = scalar_lea.vmem %s3523_s2, 4096  ;;  %p3525_p2 = scmp.lt.s32.totalorder %s629_s17, %s3523_s2 }
  0x34   : > { %s627_s1 = scalar_lea.hbm %s4468_s6, %s3896_s24  ;;  %p3520_p0 = pnand %p3518_p13, %p3915_p12 }
  0x35   : > { %p3526_p3 = scmp.lt.s32.totalorder %s3524_s25, %s3517_s16 }
  0x36   : > { %p3521_p1 = pneg %p3520_p0 }
  0x37   : > { %p3527_p4 = por %p3526_p3, %p3525_p2 }
  0x39   : > { %p3528_p5 = pnand %p3527_p4, %p3521_p1 }
  0x3b   : > { %3531 = shalt.err (!%p3528_p5)
}
  0x3c   : > { %s4424_s23 = smov 64   ;;  %s4426_s6 = smov 4  }
  0x3d   : > { %3302 = dma.hbm_to_vmem [thread:$0]  (!%p3898_p10), %s627_s1, 2048, %s629_s17, %s3911_s26, %s4424_s23, %s4424_s23, %s4426_s6  }
  0x3e   : > { %p749_p6 = scmp.lt.s32.totalorder %s3718_s20, 5  ;;  %s4470_s12 = sld [smem:[#allocation41_spill]] }
  0x3f   : > { %s688_s15 = scalar_lea.vmem [#allocation8], %s3893_s22  ;;  %s4472_s11 = sand.u32 1, %s3718_s20  }
  0x40   : > { %p3934_p7 = pnand %p2798_p11, %p749_p6  ;;  %s695_s13 = sshll.u32 %s688_s15, 4  ;;  %s696_s13 = int_to_ptr.vmem [resolvable:$true] %s695_s13 }
  0x41   : > { %s3941_s10 = scalar_lea.sflag [#allocation9], %s4472_s11  ;;  %s3545_s9 = scalar_lea.vmem %s696_s13, 2048 }
  0x42   : > { %p3546_p8 = scmp.ne.s32.totalorder %s696_s13, %s3545_s9  ;;  %s3723_s17 = smov [#allocation8]  }
  0x43   : > { %s3550_s1 = sshll.u32 %s3723_s17, 4  ;;  %s3551_s1 = int_to_ptr.vmem [resolvable:$false] %s3550_s1 }
  0x44   : > { %s694_s2 = scalar_lea.hbm %s4470_s12, %s3896_s24  ;;  %p3548_p13 = pnand %p3546_p8, %p3915_p12 }
  0x45   : > { %s3552_s16 = scalar_lea.vmem %s3551_s1, 4096  ;;  %p3553_p1 = scmp.lt.s32.totalorder %s696_s13, %s3551_s1 }
  0x46   : > { %p3549_p0 = pneg %p3548_p13  ;;  %p3554_p11 = scmp.lt.s32.totalorder %s3552_s16, %s3545_s9 }
  0x48   : > { %p3555_p2 = por %p3554_p11, %p3553_p1 }
  0x4a   : > { %p3556_p3 = pnand %p3555_p2, %p3549_p0 }
  0x4c   : > { %3559 = shalt.err (!%p3556_p3)
}
  0x4d   : > { %s3724_s21 = smov 128   ;;  %s3725_s11 = smov 8  }
  0x4e   : > { %3308 = dma.hbm_to_vmem [thread:$0]  (!%p3898_p10), %s694_s2, 2048, %s696_s13, %s3941_s10, %s3724_s21, %s3724_s21, %s3725_s11  }
  0x4f   : > { %s4473_s4 = sld [smem:[#allocation33_spill]]  ;;  %s593_s1 = scalar_lea.vmem [#allocation3], %s3893_s22 }
  0x50   : > { %s600_s9 = sshll.u32 %s593_s1, 4  ;;  %s4474_s8 = sld [smem:[#allocation37_spill]]  ;;  %s601_s9 = int_to_ptr.vmem [resolvable:$true] %s600_s9 }
  0x51   : > { %s4475_s7 = sand.u32 1, %s3698_s29   ;;  %s3573_s3 = scalar_lea.vmem %s601_s9, 2048 }
  0x52   : > { %s590_s5 = scalar_lea.sflag [#allocation4], %s4475_s7  ;;  %p3574_p4 = scmp.ne.s32.totalorder %s601_s9, %s3573_s3 }
  0x53   : > { %s3726_s30 = smov [#allocation3]  }
  0x54   : > { %p3576_p5 = pnand %p3574_p4, %p3915_p12  ;;  %s3578_s13 = sshll.u32 %s3726_s30, 4  ;;  %s3579_s13 = int_to_ptr.vmem [resolvable:$false] %s3578_s13 }
  0x55   : > { %s599_s23 = scalar_lea.hbm %s4473_s4, %s3896_s24  ;;  %s3580_s2 = scalar_lea.vmem %s3579_s13, 4096 }
  0x56   : > { %s655_s12 = scalar_lea.hbm %s4474_s8, %s3896_s24  ;;  %p3577_p6 = pneg %p3576_p5 }
  0x57   : > { %p3581_p8 = scmp.lt.s32.totalorder %s601_s9, %s3579_s13  ;;  %p3582_p13 = scmp.lt.s32.totalorder %s3580_s2, %s3573_s3 }
  0x59   : > { %p3583_p0 = por %p3582_p13, %p3581_p8 }
  0x5b   : > { %p3584_p1 = pnand %p3583_p0, %p3577_p6 }
  0x5d   : > { %3587 = shalt.err (!%p3584_p1)
}
  0x5e   : > { %s4476_s6 = smov 4   ;;  %s4477_s21 = smov 64  }
  0x5f   : > { %3299 = dma.hbm_to_vmem [thread:$0]  (!%p3898_p10), %s599_s23, 2048, %s601_s9, %s590_s5, %s4477_s21, %s4477_s21, %s4476_s6  }
  0x60   : > { %s649_s7 = scalar_lea.vmem [#allocation7], %s3893_s22  ;;  %s4478_s14 = sld [smem:[#allocation43_spill]] }
  0x61   : > { %s656_s11 = sshll.u32 %s649_s7, 4  ;;  %s3727_s1 = smov [#allocation7]   ;;  %s657_s11 = int_to_ptr.vmem [resolvable:$true] %s656_s11 }
  0x62   : > { %s3601_s3 = scalar_lea.vmem %s657_s11, 2048  ;;  %s3606_s16 = sshll.u32 %s3727_s1, 4  ;;  %s3607_s16 = int_to_ptr.vmem [resolvable:$false] %s3606_s16 }
  0x63   : > { %p3602_p11 = scmp.ne.s32.totalorder %s657_s11, %s3601_s3  ;;  %s3608_s13 = scalar_lea.vmem %s3607_s16, 4096 }
  0x64   : > { %p3609_p4 = scmp.lt.s32.totalorder %s657_s11, %s3607_s16  ;;  %p3610_p5 = scmp.lt.s32.totalorder %s3608_s13, %s3601_s3 }
  0x65   : > { %p3604_p2 = pnand %p3602_p11, %p3915_p12 }
  0x66   : > { %s722_s17 = scalar_lea.hbm %s4478_s14, %s3896_s24  ;;  %p3611_p6 = por %p3610_p5, %p3609_p4 }
  0x67   : > { %p3605_p3 = pneg %p3604_p2 }
  0x69   : > { %p3612_p8 = pnand %p3611_p6, %p3605_p3 }
  0x6b   : > { %3615 = shalt.err (!%p3612_p8)
}
  0x6c   : > { %3305 = dma.hbm_to_vmem [thread:$0]  (!%p3898_p10), %s655_s12, 2048, %s657_s11, %s3911_s26, %s4477_s21, %s4477_s21, %s4476_s6  }
  0x6d   : > { %s716_s9 = scalar_lea.vmem [#allocation10], %s3893_s22  ;;  %s3728_s30 = smov [#allocation10]  }
  0x6e   : > { %s723_s2 = sshll.u32 %s716_s9, 4  ;;  %s3634_s15 = sshll.u32 %s3728_s30, 4  ;;  %s724_s2 = int_to_ptr.vmem [resolvable:$true] %s723_s2  ;;  %s3635_s15 = int_to_ptr.vmem [resolvable:$false] %s3634_s15 }
  0x6f   : > { %s3629_s7 = scalar_lea.vmem %s724_s2, 2048  ;;  %s3636_s3 = scalar_lea.vmem %s3635_s15, 4096 }
  0x70   : > { %p3630_p13 = scmp.ne.s32.totalorder %s724_s2, %s3629_s7  ;;  %p3637_p11 = scmp.lt.s32.totalorder %s724_s2, %s3635_s15 }
  0x71   : > { %p3638_p2 = scmp.lt.s32.totalorder %s3636_s3, %s3629_s7 }
  0x72   : > { %p3632_p0 = pnand %p3630_p13, %p3915_p12 }
  0x73   : > { %p3639_p3 = por %p3638_p2, %p3637_p11 }
  0x74   : > { %p3633_p1 = pneg %p3632_p0 }
  0x76   : > { %p3640_p4 = pnand %p3639_p3, %p3633_p1 }
  0x78   : > { %3643 = shalt.err (!%p3640_p4)
}
  0x79   : > { %3311 = dma.hbm_to_vmem [thread:$0]  (!%p3898_p10), %s722_s17, 2048, %s724_s2, %s3941_s10, %s4477_s21, %s4477_s21, %s4476_s6  }
  0x7a   : > { %753 = sbr.rel (%p3934_p7) target bundleno = 3087 (0xc0f), region = 92 }
  0x7f   : > { %s755_s19 = sand.u32 1, %s3694_s28  }
  0x80   : > { %s4001_s26 = sshll.u32 %s755_s19, 7  ;;  %s756_s27 = scalar_lea.sflag [#allocation4], %s755_s19 }
  0x81   : > { %s4004_s11 = scalar_lea.vmem [#allocation3], %s4001_s26 }
  0x82   : > { %3677 = dma.done.wait (%p3887_p9), %s756_s27, 2048  }
  0x83   : > { %3679 = vsyncadd (%p3887_p9), %s756_s27, 4294965248  ;;  %s4479_s24 = sadd.s32 4294967295, %s3718_s20   ;;  %s4013_s6 = scalar_lea.vmem [#allocation5], %s4001_s26 }
  0x84   : > { %s764_s10 = sand.u32 1, %s4479_s24   ;;  %4480 = sst [smem:[#allocation23_spill]] %s4013_s6 }
  0x85   : > { %s765_s25 = scalar_lea.sflag [#allocation6], %s764_s10 }
  0x86   : > { %3681 = dma.done.wait (%p3887_p9), %s765_s25, 4096  }
  0x87   : > { %3683 = vsyncadd (%p3887_p9), %s765_s25, 4294963200  ;;  %s4020_s21 = scalar_lea.vmem [#allocation7], %s4001_s26  ;;  %s783_s17 = scalar_lea.sflag [#allocation9], %s764_s10 }
  0x88   : > { %4481 = sst [smem:[#allocation24_spill]] %s4020_s21  ;;  %s4023_s1 = scalar_lea.vmem [#allocation8], %s4001_s26 }
  0x89   : > { %4482 = sst [smem:[#allocation25_spill]] %s4023_s1 }
  0x8a   : > { %3685 = dma.done.wait (%p3887_p9), %s783_s17, 4096  }
  0x8b   : > { %3687 = vsyncadd (%p3887_p9), %s783_s17, 4294963200  ;;  %s4483_s16 = sld [smem:[#allocation16_spill]]  ;;  %p913_p10 = scmp.lt.s32.totalorder %s3706_s0, 1 }
  0x8c   : > { %s4486_s15 = sld [smem:[#allocation29_spill]] }
  0x8d   : > { %s4534_s0 = smov (!%p913_p10, %s3706_s0), 1  ;;  %s4487_s27 = sld [smem:[#allocation31_spill]] }
  0x8e   : > { %4484 = sst [smem:[#allocation26_spill]] %s4534_s0  ;;  %s2804_s18 = sshll.u32 %s4534_s0, 3 }
  0x8f   : > { %s4488_s4 = sld [smem:[#allocation32_spill]] }
  0x90   : > { %s4490_s7 = sld [smem:[#allocation34_spill]] }
  0x91   : > { %p920_p12 = scmp.lt.s32.totalorder %s4483_s16, 1  ;;  %s4495_s1 = sld [smem:[#allocation40_spill]] }
  0x92   : > { %s916_s3 = scalar_lea.vmem %s4486_s15, %s2804_s18  ;;  %s4497_s22 = sld [smem:[#allocation44_spill]] }
  0x93   : > { %s4035_s13 = scalar_select %p920_p12, %s4483_s16, 1 }
  0x94   : > { %s4498_s2 = sld [smem:[#allocation45_spill]]  ;;  %p2812_p9 = scmp.ne.s32.totalorder %s4483_s16, 0 }
  0x95   : > { %s2999_s12 = sshll.u32 %s4035_s13, 7  ;;  %s4052_s10 = sshll.u32 %s4035_s13, 1 }
  0x96   : > { %s4049_s24 = scalar_lea.vmem %s4487_s27, %s2999_s12  ;;  %s4058_s5 = scalar_lea.vmem %s4488_s4, %s4052_s10 }
  0x97   : > { %4489 = sst [smem:[#allocation27_spill]] %s4058_s5  ;;  %s4064_s30 = scalar_lea.vmem %s4490_s7, %s4052_s10 }
  0x98   : > { %s4491_s12 = sld [smem:[#allocation36_spill]]  ;;  %s945_s21 = scalar_lea.vmem %s4495_s1, %s4035_s13 }
  0x99   : > { %s4496_s7 = sld [smem:[#allocation42_spill]]  ;;  %s4106_s4 = scalar_lea.vmem [#allocation10], %s4001_s26 }
  0x9a   : > { %s955_s8 = scalar_lea.vmem %s4498_s2, %s4035_s13  ;;  %s4499_s25 = sld [smem:[#allocation46_spill]] }
  0x9b   : > { %s4500_s20 = sld [smem:[#allocation47_spill]] }
  0x9d   : > { %967 = sbr.rel (%p2812_p9) target bundleno = 164 (0xa4), region = 116 }
  0x9e   : > { %s4070_s19 = scalar_lea.vmem %s4491_s12, %s4052_s10  ;;  %s952_s12 = scalar_lea.vmem %s4497_s22, %s4035_s13 }
  0x9f   : > { %4492 = sst [smem:[#allocation28_spill]] %s4070_s19  ;;  %s949_s0 = scalar_lea.vmem %s4496_s7, %s4052_s10 }
  0xa0   : > { %s958_s29 = scalar_lea.vmem %s4499_s25, %s4035_s13 }
  0xa1   : > { %s4103_s1 = scalar_lea.vmem %s4500_s20, %s2804_s18 }
  0xa2   : > { %v968_v0 = vld [vmem:[%s916_s3] sm:$0xff] }
  0xa3   : > { %969 = vst [vmem:[#allocation2] sm:$0xff] %v968_v0 }
  0xa4 PF: > { %v3384_v1 = vld [vmem:[%s4004_s11 + $0x38] sm:$0xff]   ;;  %v3729_v2 = vmov 0.0   ;;  %v3385_v3 = vld [vmem:[%s4049_s24 + $0x38] sm:$0xff]   ;;  %vm3730_vm0 = vmmov 0   ;;  %v3387_v5 = vld [vmem:[%s4049_s24 + $0x30] sm:$0xff]   ;;  %s4501_s14 = sld [smem:[#allocation27_spill]] }
  0xa5   : > { %3122 = vmatprep.subr.bf16.mxu1 %v3729_v2  ;;  %3102 = vmatprep.subr.bf16.mxu0 %v3729_v2  ;;  %v3386_v4 = vld [vmem:[%s4004_s11 + $0x30] sm:$0xff]   ;;  %v3388_v6 = vld [vmem:[%s4004_s11 + $0x28] sm:$0xff]   ;;  %v3389_v7 = vld [vmem:[%s4049_s24 + $0x28] sm:$0xff]   ;;  %s4502_s28 = sld [smem:[#allocation23_spill]]  ;;  %vm1354_vm1 = vcmask 64512   ;;  %vm1371_vm2 = vcmask 1043456  }
  0xa6   : > { %3123 = vmatpush3.bf16.msra.mxu1 %v3384_v1  ;;  %3138 = vmatprep.mubr.msk.bf16.mxu1 %vm3730_vm0, %v3729_v2  ;;  %v3390_v8 = vld [vmem:[%s4004_s11 + $0x20] sm:$0xff]   ;;  %v3391_v9 = vld [vmem:[%s4049_s24 + $0x20] sm:$0xff]   ;;  %v3393_v11 = vld [vmem:[%s4049_s24 + $0x18] sm:$0xff]   ;;  %s4503_s26 = sld [smem:[#allocation26_spill]] }
  0xa7   : > { %3103 = vmatpush3.bf16.msra.mxu0 %v3385_v3  ;;  %3124 = vmatprep.subr.bf16.mxu1 %v3729_v2  ;;  %v3392_v10 = vld [vmem:[%s4004_s11 + $0x18] sm:$0xff]   ;;  %v3394_v12 = vld [vmem:[%s4004_s11 + $0x10] sm:$0xff]   ;;  %v3395_v13 = vld [vmem:[%s4049_s24 + $0x10] sm:$0xff]   ;;  %s4504_s18 = sld [smem:[#allocation30_spill]] }
  0xa8   : > { %3104 = vmatprep.subr.bf16.mxu0 %v3729_v2  ;;  %3118 = vmatprep.mubr.msk.bf16.mxu0 %vm3730_vm0, %v3729_v2  ;;  %v3396_v14 = vld [vmem:[%s4004_s11 + $0x8] sm:$0xff]   ;;  %v3397_v15 = vld [vmem:[%s4049_s24 + $0x8] sm:$0xff]   ;;  %v3399_v18 = vld [vmem:[%s4049_s24] sm:$0xff]   ;;  %s4506_s5 = sld [smem:[#allocation28_spill]] }
  0xa9   : > { %v3398_v16 = vld [vmem:[%s4004_s11] sm:$0xff]   ;;  %v2822_v20 = vld [vmem:[%s4064_s30] ss:$0 sm:$0xff]  ;;  %v3409_v59 = vld [vmem:[%s4004_s11 + $0x70] sm:$0xff]   ;;  %s4509_s23 = sld [smem:[#allocation38_spill]] }
  0xaa   : > { %3125 = vmatpush3.bf16.msra.mxu1 %v3386_v4  ;;  %v4142_v17 = vld [vmem:[#allocation2] sm:$0xff]  ;;  %v3410_v0 = vld [vmem:[%s4004_s11 + $0x68] sm:$0xff]   ;;  %v3411_v1 = vld [vmem:[%s4004_s11 + $0x60] sm:$0xff]   ;;  %s4511_s22 = sld [smem:[#allocation39_spill]] }
  0xab   : > { %3105 = vmatpush3.bf16.msra.mxu0 %v3387_v5  ;;  %3126 = vmatprep.subr.bf16.mxu1 %v3729_v2  ;;  %v4149_v19 = vpack.c.bf16 %v4142_v17, %v4142_v17  ;;  %v2813_v23 = vld [vmem:[%s4501_s14] ss:$0 sm:$0xff]  ;;  %v3400_v34 = vld [vmem:[%s4502_s28 + $0x38] sm:$0xff]   ;;  %v3401_v35 = vld [vmem:[%s4502_s28 + $0x30] sm:$0xff]  }
  0xac   : > { %3106 = vmatprep.subr.bf16.mxu0 %v3729_v2  ;;  %v3402_v36 = vld [vmem:[%s4502_s28 + $0x28] sm:$0xff]   ;;  %v3403_v37 = vld [vmem:[%s4502_s28 + $0x20] sm:$0xff]   ;;  %v3404_v38 = vld [vmem:[%s4502_s28 + $0x18] sm:$0xff]  }
  0xad   : > { %v3405_v39 = vld [vmem:[%s4502_s28 + $0x10] sm:$0xff]   ;;  %v3406_v40 = vld [vmem:[%s4502_s28 + $0x8] sm:$0xff]   ;;  %v3407_v41 = vld [vmem:[%s4502_s28] sm:$0xff]   ;;  %s4505_s3 = scalar_lea.vmem %s4504_s18, %s4503_s26 }
  0xae   : > { %3127 = vmatpush3.bf16.msra.mxu1 %v3388_v6  ;;  %v4188_v42 = vld [vmem:[%s4505_s3] ss:$0 sm:$0xff]  ;;  %v3415_v4 = vld [vmem:[%s4004_s11 + $0x50] sm:$0xff]   ;;  %v3417_v5 = vld [vmem:[%s4004_s11 + $0x48] sm:$0xff]   ;;  %s4518_s3 = sld [smem:[#allocation16_spill]] }
  0xaf   : > { %3107 = vmatpush3.bf16.msra.mxu0 %v3389_v7  ;;  %3128 = vmatprep.subr.bf16.mxu1 %v3729_v2  ;;  %v2831_v54 = vld [vmem:[%s4506_s5] ss:$0 sm:$0xff]  ;;  %v3419_v6 = vld [vmem:[%s4004_s11 + $0x40] sm:$0xff]   ;;  %s4510_s9 = scalar_lea.vmem %s4509_s23, %s4035_s13 }
  0xb0   : > { %3108 = vmatprep.subr.bf16.mxu0 %v3729_v2  ;;  %v3408_v56 = vld [vmem:[%s4004_s11 + $0x78] sm:$0xff]   ;;  %s4512_s2 = scalar_lea.vmem %s4511_s22, %s4035_s13 }
  0xb1   : > { %v3413_v3 = vld [vmem:[%s4004_s11 + $0x58] sm:$0xff]   ;;  %s4507_s11 = sld [smem:[#allocation24_spill]] }
  0xb2   : > { %3129 = vmatpush3.bf16.msra.mxu1 %v3390_v8 }
  0xb3   : > { %3109 = vmatpush3.bf16.msra.mxu0 %v3391_v9  ;;  %3130 = vmatprep.subr.bf16.mxu1 %v3729_v2 }
  0xb4   : > { %3110 = vmatprep.subr.bf16.mxu0 %v3729_v2  ;;  %p2991_p7 = scmp.ne.s32.totalorder %s4518_s3, 1 }
  0xb6   : > { %3131 = vmatpush3.bf16.msra.mxu1 %v3392_v10  ;;  %v3412_v10 = vld [vmem:[%s4049_s24 + $0x78] sm:$0xff]  }
  0xb7   : > { %3111 = vmatpush3.bf16.msra.mxu0 %v3393_v11  ;;  %3132 = vmatprep.subr.bf16.mxu1 %v3729_v2 }
  0xb8   : > { %3112 = vmatprep.subr.bf16.mxu0 %v3729_v2 }
  0xba   : > { %3133 = vmatpush3.bf16.msra.mxu1 %v3394_v12  ;;  %v3414_v12 = vld [vmem:[%s4049_s24 + $0x70] sm:$0xff]  }
  0xbb   : > { %3113 = vmatpush3.bf16.msra.mxu0 %v3395_v13  ;;  %3134 = vmatprep.subr.bf16.mxu1 %v3729_v2  ;;  %v3416_v13 = vld [vmem:[%s4049_s24 + $0x68] sm:$0xff]  }
  0xbc   : > { %3114 = vmatprep.subr.bf16.mxu0 %v3729_v2 }
  0xbe   : > { %3135 = vmatpush3.bf16.msra.mxu1 %v3396_v14  ;;  %v3418_v14 = vld [vmem:[%s4049_s24 + $0x60] sm:$0xff]  }
  0xbf   : > { %3115 = vmatpush3.bf16.msra.mxu0 %v3397_v15  ;;  %3136 = vmatprep.subr.bf16.mxu1 %v3729_v2  ;;  %v3420_v15 = vld [vmem:[%s4049_s24 + $0x58] sm:$0xff]  }
  0xc0   : > { %3116 = vmatprep.subr.bf16.mxu0 %v3729_v2 }
  0xc2   : > { %3137 = vmatpush3.bf16.msra.mxu1 %v3398_v16  ;;  %v3421_v16 = vld [vmem:[%s4049_s24 + $0x50] sm:$0xff]  }
  0xc3   : > { %3117 = vmatpush3.bf16.msra.mxu0 %v3399_v18  ;;  %3162 = vmatprep.subr.bf16.mxu1 %v3729_v2  ;;  %v3422_v18 = vld [vmem:[%s4049_s24 + $0x48] sm:$0xff]  }
  0xc4   : > { %3142 = vmatprep.subr.bf16.mxu0 %v3729_v2 }
  0xc5   : > { %3139 = vmatmul.mubr.bf16.vlgmr.msra.gmra.mxu1 %v4149_v19 }
  0xc6   : > { %3119 = vmatmul.mubr.bf16.vlgmr.msra.gmra.mxu0 %v4149_v19  ;;  %3164 = vmatprep.mubr.msk.bf16.mxu1 %vm3730_vm0, %v3729_v2 }
  0xc7   : > { %3158 = vmatprep.mubr.msk.bf16.mxu0 %vm3730_vm0, %v3729_v2  ;;  %3143 = vmatpush3.bf16.msra.mxu0 %v3400_v34  ;;  %v2885_v34 = vld [vmem:[%s4064_s30 + $0x1] ss:$0 sm:$0xff] }
  0xc8   : > { %3144 = vmatprep.subr.bf16.mxu0 %v3729_v2 }
  0xcb   : > { %3145 = vmatpush3.bf16.msra.mxu0 %v3401_v35 }
  0xcc   : > { %3146 = vmatprep.subr.bf16.mxu0 %v3729_v2 }
  0xcf   : > { %3147 = vmatpush3.bf16.msra.mxu0 %v3402_v36 }
  0xd0   : > { %3148 = vmatprep.subr.bf16.mxu0 %v3729_v2 }
  0xd3   : > { %3149 = vmatpush3.bf16.msra.mxu0 %v3403_v37  ;;  %v3438_v37 = vld [vmem:[%s4507_s11 + $0x8] sm:$0xff]  }
  0xd4   : > { %3150 = vmatprep.subr.bf16.mxu0 %v3729_v2 }
  0xd7   : > { %3151 = vmatpush3.bf16.msra.mxu0 %v3404_v38 }
  0xd8   : > { %3152 = vmatprep.subr.bf16.mxu0 %v3729_v2 }
  0xdb   : > { %3153 = vmatpush3.bf16.msra.mxu0 %v3405_v39 }
  0xdc   : > { %3154 = vmatprep.subr.bf16.mxu0 %v3729_v2 }
  0xdf   : > { %3155 = vmatpush3.bf16.msra.mxu0 %v3406_v40 }
  0xe0   : > { %3156 = vmatprep.subr.bf16.mxu0 %v3729_v2 }
  0xe3   : > { %3157 = vmatpush3.bf16.msra.mxu0 %v3407_v41  ;;  %v3439_v41 = vld [vmem:[%s4507_s11] sm:$0xff]  }
  0xe4   : > { %3194 = vmatprep.subr.bf16.mxu0 %v3729_v2 }
  0xe6   : > { %3159 = vmatmul.mubr.bf16.vlgmr.msra.gmra.mxu0 %v4149_v19 }
  0xe7   : > { %3210 = vmatprep.mubr.msk.bf16.mxu0 %vm3730_vm0, %v3729_v2  ;;  %3195 = vmatpush3.bf16.msra.mxu0 %v3408_v56  ;;  %v2911_v56 = vld [vmem:[%s4506_s5 + $0x1] ss:$0 sm:$0xff] }
  0xe8   : > { %3196 = vmatprep.subr.bf16.mxu0 %v3729_v2 }
  0xeb   : > { %3197 = vmatpush3.bf16.msra.mxu0 %v3409_v59 }
  0xec   : > { %3198 = vmatprep.subr.bf16.mxu0 %v3729_v2 }
  0xef   : > { %3199 = vmatpush3.bf16.msra.mxu0 %v3410_v0 }
  0xf0   : > { %3200 = vmatprep.subr.bf16.mxu0 %v3729_v2 }
  0xf3   : > { %3201 = vmatpush3.bf16.msra.mxu0 %v3411_v1 }
  0xf4   : > { %3202 = vmatprep.subr.bf16.mxu0 %v3729_v2 }
  0xf7   : > { %3203 = vmatpush3.bf16.msra.mxu0 %v3413_v3 }
  0xf8   : > { %3204 = vmatprep.subr.bf16.mxu0 %v3729_v2 }
  0xfb   : > { %3205 = vmatpush3.bf16.msra.mxu0 %v3415_v4 }
  0xfc   : > { %3206 = vmatprep.subr.bf16.mxu0 %v3729_v2 }
  0xff   : > { %3207 = vmatpush3.bf16.msra.mxu0 %v3417_v5 }
 0x100   : > { %3208 = vmatprep.subr.bf16.mxu0 %v3729_v2 }
 0x103   : > { %3209 = vmatpush3.bf16.msra.mxu0 %v3419_v6 }
 0x104   : > { %3234 = vmatprep.subr.bf16.mxu0 %v3729_v2 }
 0x106   : > { %3211 = vmatmul.mubr.bf16.vlgmr.msra.gmra.mxu0 %v4149_v19 }
 0x107   : > { %3236 = vmatprep.mubr.msk.bf16.mxu0 %vm3730_vm0, %v3729_v2 }
 0x185   : > { %v1189_v21 = vpop.f32.mrf.mxu1 }
 0x186   : > { %v1190_v22 = vadd.f32 %v2822_v20, %v1189_v21  ;;  %v1078_v24 = vpop.f32.mrf.mxu0  ;;  %v3423_v20 = vld [vmem:[%s4049_s24 + $0x40] sm:$0xff]   ;;  %v3424_v21 = vld [vmem:[%s4502_s28 + $0x78] sm:$0xff]   ;;  %s4508_s24 = sld [smem:[#allocation25_spill]] }
 0x187   : > { %v3140_v25 = vpop.f32.mrf.mxu1  ;;  %v1079_v28 = vadd.f32 %v2813_v23, %v1078_v24  ;;  %v3426_v23 = vld [vmem:[%s4502_s28 + $0x68] sm:$0xff]   ;;  %v3427_v24 = vld [vmem:[%s4502_s28 + $0x60] sm:$0xff]  }
 0x188   : > { %v1307_v26 = vpack.c.bf16 %v1190_v22, %v1190_v22  ;;  %v3120_v27 = vpop.f32.mrf.mxu0  ;;  %v3425_v22 = vld [vmem:[%s4502_s28 + $0x70] sm:$0xff]   ;;  %v3428_v25 = vld [vmem:[%s4502_s28 + $0x58] sm:$0xff]  }
 0x189   : > { %v1192_v29 = vpop.f32.mrf.mxu1  ;;  %v1306_v33 = vpack.c.bf16 %v1079_v28, %v1079_v28  ;;  %v3430_v27 = vld [vmem:[%s4502_s28 + $0x48] sm:$0xff]   ;;  %v3431_v28 = vld [vmem:[%s4502_s28 + $0x40] sm:$0xff]  }
 0x18a   : > { %3163 = vmatpush3.bf16.xpose.msra.mxu1 %v1307_v26  ;;  %v1081_v30 = vpop.f32.mrf.mxu0  ;;  %v3429_v26 = vld [vmem:[%s4502_s28 + $0x50] sm:$0xff]   ;;  %v3432_v29 = vld [vmem:[%s4507_s11 + $0x38] sm:$0xff]  }
 0x18b   : > { %v3141_v31 = vpop.f32.mrf.mxu1  ;;  %3168 = vmatprep.subr.bf16.mxu1 %v3729_v2  ;;  %v3433_v30 = vld [vmem:[%s4507_s11 + $0x30] sm:$0xff]  }
 0x18c   : > { %v3121_v32 = vpop.f32.mrf.mxu0  ;;  %v3434_v31 = vld [vmem:[%s4507_s11 + $0x28] sm:$0xff]  }
 0x18d   : > { %v3435_v32 = vld [vmem:[%s4507_s11 + $0x20] sm:$0xff]  }
 0x191   : > { %3165 = vmatmul.mubr.bf16.vlgmr.msra.gmra.mxu1 %v1306_v33  ;;  %v3436_v33 = vld [vmem:[%s4507_s11 + $0x18] sm:$0xff]  }
 0x192   : > { %3170 = vmatprep.mubr.msk.bf16.mxu1 %vm3730_vm0, %v3729_v2 }
 0x1a6   : > { %v1300_v55 = vpop.f32.mrf.mxu0 }
 0x1a7   : > { %v1301_v57 = vadd.f32 %v2831_v54, %v1300_v55 }
 0x1a8   : > { %v3160_v58 = vpop.f32.mrf.mxu0 }
 0x1a9   : > { %v1367_v60 = vpack.c.bf16 %v1301_v57, %v1301_v57 }
 0x1aa   : > { %v1303_v61 = vpop.f32.mrf.mxu0 }
 0x1ab   : > { %v1373_v62 = vsel %vm1371_vm2, %v1367_v60, 0 }
 0x1ac   : > { %v3161_v63 = vpop.f32.mrf.mxu0  ;;  %3169 = vmatpush3.bf16.msra.mxu1 %v1373_v62 }
 0x1ad   : > { %3174 = vmatprep.subr.bf16.mxu1 %v3729_v2 }
 0x1c6   : > { %v1652_v35 = vpop.f32.mrf.mxu0 }
 0x1c7   : > { %v1653_v36 = vadd.f32 %v2885_v34, %v1652_v35  ;;  %v2953_v34 = vld [vmem:[%s4510_s9] ss:$0 sm:$0xff] }
 0x1c8   : > { %v3212_v38 = vpop.f32.mrf.mxu0 }
 0x1c9   : > { %v1772_v39 = vpack.c.bf16 %v1653_v36, %v1653_v36 }
 0x1ca   : > { %v1655_v40 = vpop.f32.mrf.mxu0 }
 0x1cb   : > { %3235 = vmatpush3.bf16.xpose.msra.mxu0 %v1772_v39  ;;  %v3448_v40 = vld [vmem:[%s4508_s24 + $0x70] ss:$8 sps:$4 sm:$0xff]  }
 0x1cc   : > { %3240 = vmatprep.subr.bf16.mxu0 %v3729_v2 }
 0x251   : > { %v1348_v43 = vpop.f32.mrf.mxu1 }
 0x252   : > { %v1349_v44 = vadd.f32 %v4188_v42, %v1348_v43  ;;  %v3213_v43 = vpop.f32.mrf.mxu0 }
 0x253   : > { %v3166_v45 = vpop.f32.mrf.mxu1  ;;  %v3453_v43 = vld [vmem:[%s4508_s24 + $0x64] ss:$8 sps:$4 sm:$0xff]  }
 0x254   : > { %v1355_v46 = vsel %vm1354_vm1, %v1349_v44, -inf }
 0x255   : > { %1356 = vmax.xlane.f32.xlu0 %v1355_v46  ;;  %v1351_v47 = vpop.f32.mrf.mxu1 }
 0x257   : > { %v3167_v48 = vpop.f32.mrf.mxu1 }
 0x2de   : > { %v1357_v49 = vpop.xlane.xlu0 %1356 }
 0x2df   : > { %v1358_v50 = vsub.f32 %v1349_v44, %v1357_v49  ;;  %v2859_v49 = vld [vmem:[%s4501_s14 + $0x1] ss:$0 sm:$0xff] }
 0x2e1   : > { %v1359_v51 = vmul.f32 1.442695, %v1358_v50 }
 0x2e3   : > { %3488 = vpow2.f32 %v1359_v51 }
 0x2f0   : > { %v3489_v52 = vpop.eup %3488 }
 0x2f1   : > { %v1361_v53 = vsel %vm1354_vm1, %v3489_v52, 0.0 }
 0x2f2   : > { %1362 = vadd.xlane.f32.xlu0 %v1361_v53 }
 0x37b   : > { %v1363_v7 = vpop.xlane.xlu0 %1362 }
 0x37c   : > { %3490 = vrcp.f32 %v1363_v7 }
 0x389   : > { %v3491_v8 = vpop.eup %3490 }
 0x38a   : > { %v1365_v9 = vmul.f32 %v3491_v8, %v3489_v52 }
 0x38c   : > { %v1366_v11 = vpack.c.bf16 %v1365_v9, %v1365_v9 }
 0x38e   : > { %3171 = vmatmul.mubr.msk.bf16.vlgmr.msra.gmra.mxu1 %vm1354_vm1, %v1366_v11 }
 0x38f   : > { %3175 = vmatpush3.bf16.msra.mxu1 %v3412_v10  ;;  %3190 = vmatprep.mubr.msk.bf16.mxu1 %vm3730_vm0, %v3729_v2 }
 0x390   : > { %3176 = vmatprep.subr.bf16.mxu1 %v3729_v2 }
 0x393   : > { %3177 = vmatpush3.bf16.msra.mxu1 %v3414_v12 }
 0x394   : > { %3178 = vmatprep.subr.bf16.mxu1 %v3729_v2 }
 0x397   : > { %3179 = vmatpush3.bf16.msra.mxu1 %v3416_v13 }
 0x398   : > { %3180 = vmatprep.subr.bf16.mxu1 %v3729_v2 }
 0x39b   : > { %3181 = vmatpush3.bf16.msra.mxu1 %v3418_v14 }
 0x39c   : > { %3182 = vmatprep.subr.bf16.mxu1 %v3729_v2 }
 0x39f   : > { %3183 = vmatpush3.bf16.msra.mxu1 %v3420_v15 }
 0x3a0   : > { %3184 = vmatprep.subr.bf16.mxu1 %v3729_v2 }
 0x3a3   : > { %3185 = vmatpush3.bf16.msra.mxu1 %v3421_v16 }
 0x3a4   : > { %3186 = vmatprep.subr.bf16.mxu1 %v3729_v2 }
 0x3a7   : > { %3187 = vmatpush3.bf16.msra.mxu1 %v3422_v18 }
 0x3a8   : > { %3188 = vmatprep.subr.bf16.mxu1 %v3729_v2 }
 0x3ab   : > { %3189 = vmatpush3.bf16.msra.mxu1 %v3423_v20  ;;  %v3440_v20 = vld [vmem:[%s4507_s11 + $0x78] sm:$0xff]  }
 0x3ac   : > { %3214 = vmatprep.subr.bf16.mxu1 %v3729_v2 }
 0x3ae   : > { %3191 = vmatmul.mubr.bf16.vlgmr.msra.gmra.mxu1 %v4149_v19 }
 0x3af   : > { %3215 = vmatpush3.bf16.msra.mxu1 %v3424_v21  ;;  %3230 = vmatprep.mubr.msk.bf16.mxu1 %vm3730_vm0, %v3729_v2 }
 0x3b0   : > { %3216 = vmatprep.subr.bf16.mxu1 %v3729_v2 }
 0x3b3   : > { %3217 = vmatpush3.bf16.msra.mxu1 %v3425_v22  ;;  %v3441_v22 = vld [vmem:[%s4507_s11 + $0x70] sm:$0xff]  }
 0x3b4   : > { %3218 = vmatprep.subr.bf16.mxu1 %v3729_v2 }
 0x3b7   : > { %3219 = vmatpush3.bf16.msra.mxu1 %v3426_v23  ;;  %v3442_v23 = vld [vmem:[%s4507_s11 + $0x68] sm:$0xff]  }
 0x3b8   : > { %3220 = vmatprep.subr.bf16.mxu1 %v3729_v2 }
 0x3bb   : > { %3221 = vmatpush3.bf16.msra.mxu1 %v3427_v24  ;;  %v3443_v24 = vld [vmem:[%s4507_s11 + $0x60] sm:$0xff]  }
 0x3bc   : > { %3222 = vmatprep.subr.bf16.mxu1 %v3729_v2 }
 0x3bf   : > { %3223 = vmatpush3.bf16.msra.mxu1 %v3428_v25  ;;  %v3444_v25 = vld [vmem:[%s4507_s11 + $0x58] sm:$0xff]  }
 0x3c0   : > { %3224 = vmatprep.subr.bf16.mxu1 %v3729_v2 }
 0x3c3   : > { %3225 = vmatpush3.bf16.msra.mxu1 %v3429_v26  ;;  %v3445_v26 = vld [vmem:[%s4507_s11 + $0x50] sm:$0xff]  }
 0x3c4   : > { %3226 = vmatprep.subr.bf16.mxu1 %v3729_v2 }
 0x3c7   : > { %3227 = vmatpush3.bf16.msra.mxu1 %v3430_v27  ;;  %v3446_v27 = vld [vmem:[%s4507_s11 + $0x48] sm:$0xff]  }
 0x3c8   : > { %3228 = vmatprep.subr.bf16.mxu1 %v3729_v2 }
 0x3cb   : > { %3229 = vmatpush3.bf16.msra.mxu1 %v3431_v28  ;;  %v3447_v28 = vld [vmem:[%s4507_s11 + $0x40] sm:$0xff]  }
 0x3cc   : > { %3266 = vmatprep.subr.bf16.mxu1 %v3729_v2 }
 0x3ce   : > { %3231 = vmatmul.mubr.bf16.vlgmr.msra.gmra.mxu1 %v4149_v19  ;;  %v3437_v19 = vld [vmem:[%s4507_s11 + $0x10] sm:$0xff]  }
 0x3cf   : > { %3267 = vmatpush3.bf16.msra.mxu1 %v3432_v29  ;;  %3282 = vmatprep.mubr.msk.bf16.mxu1 %vm3730_vm0, %v3729_v2 }
 0x3d0   : > { %3268 = vmatprep.subr.bf16.mxu1 %v3729_v2 }
 0x3d3   : > { %3269 = vmatpush3.bf16.msra.mxu1 %v3433_v30 }
 0x3d4   : > { %3270 = vmatprep.subr.bf16.mxu1 %v3729_v2 }
 0x3d7   : > { %3271 = vmatpush3.bf16.msra.mxu1 %v3434_v31 }
 0x3d8   : > { %3272 = vmatprep.subr.bf16.mxu1 %v3729_v2 }
 0x3db   : > { %3273 = vmatpush3.bf16.msra.mxu1 %v3435_v32 }
 0x3dc   : > { %3274 = vmatprep.subr.bf16.mxu1 %v3729_v2 }
 0x3df   : > { %3275 = vmatpush3.bf16.msra.mxu1 %v3436_v33 }
 0x3e0   : > { %3276 = vmatprep.subr.bf16.mxu1 %v3729_v2 }
 0x3e3   : > { %3277 = vmatpush3.bf16.msra.mxu1 %v3437_v19 }
 0x3e4   : > { %3278 = vmatprep.subr.bf16.mxu1 %v3729_v2 }
 0x3e7   : > { %3279 = vmatpush3.bf16.msra.mxu1 %v3438_v37 }
 0x3e8   : > { %3280 = vmatprep.subr.bf16.mxu1 %v3729_v2 }
 0x3eb   : > { %3281 = vmatpush3.bf16.msra.mxu1 %v3439_v41  ;;  %v3450_v41 = vld [vmem:[%s4508_s24 + $0x74] ss:$8 sps:$4 sm:$0xff]  }
 0x44e   : > { %v1409_v44 = vpop.f32.mrf.mxu1 }
 0x44f   : > { %v1415_v45 = vpack.c.bf16 %v1409_v44, %v1409_v44  ;;  %v3451_v44 = vld [vmem:[%s4508_s24 + $0x60] ss:$8 sps:$4 sm:$0xff]  }
 0x450   : > { %v3172_v46 = vpop.f32.mrf.mxu1 }
 0x451   : > { %3283 = vmatmul.mubr.bf16.vlgmr.msra.gmra.mxu1 %v1415_v45 }
 0x452   : > { %v1412_v47 = vpop.f32.mrf.mxu1 }
 0x454   : > { %v3173_v48 = vpop.f32.mrf.mxu1 }
 0x455   : > { %v3456_v48 = vld [vmem:[%s4508_s24 + $0x54] ss:$8 sps:$4 sm:$0xff]  }
 0x46e   : > { %v1539_v50 = vpop.f32.mrf.mxu1 }
 0x46f   : > { %v1540_v51 = vadd.f32 %v2859_v49, %v1539_v50  ;;  %v3454_v49 = vld [vmem:[%s4508_s24 + $0x50] ss:$8 sps:$4 sm:$0xff]   ;;  %v3457_v50 = vld [vmem:[%s4508_s24 + $0x40] ss:$8 sps:$4 sm:$0xff]  }
 0x470   : > { %v3192_v52 = vpop.f32.mrf.mxu1 }
 0x471   : > { %v1771_v53 = vpack.c.bf16 %v1540_v51, %v1540_v51  ;;  %v3459_v51 = vld [vmem:[%s4508_s24 + $0x44] ss:$8 sps:$4 sm:$0xff]   ;;  %v3462_v52 = vld [vmem:[%s4508_s24 + $0x34] ss:$8 sps:$4 sm:$0xff]  }
 0x472   : > { %v1542_v54 = vpop.f32.mrf.mxu1 }
 0x473   : > { %3237 = vmatmul.mubr.bf16.vlgmr.msra.gmra.mxu0 %v1771_v53  ;;  %v3460_v53 = vld [vmem:[%s4508_s24 + $0x30] ss:$8 sps:$4 sm:$0xff]   ;;  %v3465_v54 = vld [vmem:[%s4508_s24 + $0x24] ss:$8 sps:$4 sm:$0xff]  }
 0x474   : > { %v3193_v55 = vpop.f32.mrf.mxu1  ;;  %3242 = vmatprep.mubr.msk.bf16.mxu0 %vm3730_vm0, %v3729_v2 }
 0x475   : > { %v3731_v55 = vmov 0  }
 0x48e   : > { %v1765_v57 = vpop.f32.mrf.mxu1 }
 0x48f   : > { %v1766_v58 = vadd.f32 %v2911_v56, %v1765_v57  ;;  %v3463_v56 = vld [vmem:[%s4508_s24 + $0x20] ss:$8 sps:$4 sm:$0xff]   ;;  %v3468_v57 = vld [vmem:[%s4508_s24 + $0x14] ss:$8 sps:$4 sm:$0xff]  }
 0x490   : > { %v3232_v59 = vpop.f32.mrf.mxu1 }
 0x491   : > { %v1825_v60 = vpack.c.bf16 %v1766_v58, %v1766_v58  ;;  %v3466_v58 = vld [vmem:[%s4508_s24 + $0x10] ss:$8 sps:$4 sm:$0xff]   ;;  %v3471_v59 = vld [vmem:[%s4508_s24 + $0x4] ss:$8 sps:$4 sm:$0xff]  }
 0x492   : > { %v1768_v61 = vpop.f32.mrf.mxu1 }
 0x493   : > { %v1830_v62 = vsel %vm1371_vm2, %v1825_v60, 0  ;;  %v3469_v60 = vld [vmem:[%s4508_s24] ss:$8 sps:$4 sm:$0xff]  }
 0x494   : > { %v3233_v63 = vpop.f32.mrf.mxu1  ;;  %3241 = vmatpush3.bf16.msra.mxu0 %v1830_v62 }
 0x495   : > { %3246 = vmatprep.subr.bf16.mxu0 %v3729_v2 }
 0x511   : > { %v2060_v0 = vpop.f32.mrf.mxu1 }
 0x513   : > { %v3284_v1 = vpop.f32.mrf.mxu1 }
 0x514   : > { %v2954_v1 = vld [vmem:[%s4512_s2] ss:$0 sm:$0xff] }
 0x515   : > { %v2063_v3 = vpop.f32.mrf.mxu1 }
 0x517   : > { %v3285_v4 = vpop.f32.mrf.mxu1 }
 0x518   : > { %v2955_v4 = vld [vmem:[%s945_s21] ss:$0 sm:$0xff] }
 0x533   : > { %v1807_v5 = vpop.f32.mrf.mxu0 }
 0x534   : > { %v1808_v6 = vadd.f32 %v4188_v42, %v1807_v5 }
 0x535   : > { %v3238_v7 = vpop.f32.mrf.mxu0 }
 0x536   : > { %v1813_v8 = vsel %vm1354_vm1, %v1808_v6, -inf }
 0x537   : > { %1814 = vmax.xlane.f32.xlu1 %v1813_v8  ;;  %v1810_v9 = vpop.f32.mrf.mxu0  ;;  %v3472_v8 = vld [vmem:[%s4106_s4 + $0x78] sm:$0xff]  }
 0x538   : > { %v3473_v9 = vld [vmem:[%s4106_s4 + $0x38] sm:$0xff]   ;;  %3080 = vmatprep.subr.bf16.mxu1 %v3472_v8 }
 0x539   : > { %v3239_v10 = vpop.f32.mrf.mxu0  ;;  %3081 = vmatpush3.bf16.msra.mxu1 %v3473_v9 }
 0x53a   : > { %v3474_v10 = vld [vmem:[%s4106_s4 + $0x70] sm:$0xff]  }
 0x53b   : > { %3082 = vmatprep.subr.bf16.mxu1 %v3474_v10  ;;  %v2989_v10 = vld [vmem:[%s955_s8] ss:$0 sm:$0xff] }
 0x5c0   : > { %v1815_v11 = vpop.xlane.xlu1 %1814 }
 0x5c1   : > { %v1816_v12 = vsub.f32 %v1808_v6, %v1815_v11  ;;  %v3475_v11 = vld [vmem:[%s4106_s4 + $0x30] sm:$0xff]  }
 0x5c2   : > { %3083 = vmatpush3.bf16.msra.mxu1 %v3475_v11 }
 0x5c3   : > { %v1817_v13 = vmul.f32 1.442695, %v1816_v12  ;;  %v3476_v12 = vld [vmem:[%s4106_s4 + $0x68] sm:$0xff]  }
 0x5c4   : > { %3084 = vmatprep.subr.bf16.mxu1 %v3476_v12 }
 0x5c5   : > { %3492 = vpow2.f32 %v1817_v13  ;;  %v3477_v13 = vld [vmem:[%s4106_s4 + $0x28] sm:$0xff]  }
 0x5c6   : > { %3085 = vmatpush3.bf16.msra.mxu1 %v3477_v13 }
 0x5d2   : > { %v3493_v14 = vpop.eup %3492 }
 0x5d3   : > { %v1819_v15 = vsel %vm1354_vm1, %v3493_v14, 0.0 }
 0x5d4   : > { %1820 = vadd.xlane.f32.xlu1 %v1819_v15  ;;  %v3479_v15 = vld [vmem:[%s4106_s4 + $0x20] sm:$0xff]  }
 0x65d   : > { %v1821_v16 = vpop.xlane.xlu1 %1820 }
 0x65e   : > { %3494 = vrcp.f32 %v1821_v16  ;;  %v3480_v16 = vld [vmem:[%s4106_s4 + $0x58] sm:$0xff]  }
 0x66b   : > { %v3495_v42 = vpop.eup %3494 }
 0x66c   : > { %v1823_v18 = vmul.f32 %v3495_v42, %v3493_v14  ;;  %v3478_v14 = vld [vmem:[%s4106_s4 + $0x60] sm:$0xff]   ;;  %v3481_v42 = vld [vmem:[%s4106_s4 + $0x18] sm:$0xff]  }
 0x66d   : > { %3086 = vmatprep.subr.bf16.mxu1 %v3478_v14 }
 0x66e   : > { %v1824_v21 = vpack.c.bf16 %v1823_v18, %v1823_v18  ;;  %3087 = vmatpush3.bf16.msra.mxu1 %v3479_v15  ;;  %v3482_v18 = vld [vmem:[%s4106_s4 + $0x50] sm:$0xff]  }
 0x66f   : > { %3088 = vmatprep.subr.bf16.mxu1 %v3480_v16 }
 0x670   : > { %3243 = vmatmul.mubr.msk.bf16.vlgmr.msra.gmra.mxu0 %vm1354_vm1, %v1824_v21  ;;  %v3484_v21 = vld [vmem:[%s4106_s4 + $0x48] sm:$0xff]  }
 0x671   : > { %3247 = vmatpush3.bf16.msra.mxu0 %v3440_v20  ;;  %3262 = vmatprep.mubr.msk.bf16.mxu0 %vm3730_vm0, %v3729_v2  ;;  %v3483_v20 = vld [vmem:[%s4106_s4 + $0x10] sm:$0xff]  }
 0x672   : > { %3248 = vmatprep.subr.bf16.mxu0 %v3729_v2  ;;  %3089 = vmatpush3.bf16.msra.mxu1 %v3481_v42 }
 0x673   : > { %3090 = vmatprep.subr.bf16.mxu1 %v3482_v18 }
 0x675   : > { %3249 = vmatpush3.bf16.msra.mxu0 %v3441_v22  ;;  %v3485_v22 = vld [vmem:[%s4106_s4 + $0x8] sm:$0xff]  }
 0x676   : > { %3250 = vmatprep.subr.bf16.mxu0 %v3729_v2  ;;  %3091 = vmatpush3.bf16.msra.mxu1 %v3483_v20 }
 0x677   : > { %3092 = vmatprep.subr.bf16.mxu1 %v3484_v21 }
 0x679   : > { %3251 = vmatpush3.bf16.msra.mxu0 %v3442_v23  ;;  %v3486_v23 = vld [vmem:[%s4106_s4 + $0x40] sm:$0xff]  }
 0x67a   : > { %3252 = vmatprep.subr.bf16.mxu0 %v3729_v2  ;;  %3093 = vmatpush3.bf16.msra.mxu1 %v3485_v22 }
 0x67b   : > { %3094 = vmatprep.subr.bf16.mxu1 %v3486_v23 }
 0x67d   : > { %3253 = vmatpush3.bf16.msra.mxu0 %v3443_v24  ;;  %v3487_v24 = vld [vmem:[%s4106_s4] sm:$0xff]  }
 0x67e   : > { %3254 = vmatprep.subr.bf16.mxu0 %v3729_v2  ;;  %3095 = vmatpush3.bf16.msra.mxu1 %v3487_v24 }
 0x681   : > { %3255 = vmatpush3.bf16.msra.mxu0 %v3444_v25  ;;  %v2122_v25 = vlaneseq }
 0x682   : > { %3256 = vmatprep.subr.bf16.mxu0 %v3729_v2 }
 0x685   : > { %3257 = vmatpush3.bf16.msra.mxu0 %v3445_v26  ;;  %v2123_v26 = vshrl.u32 %v2122_v25, 7 }
 0x686   : > { %3258 = vmatprep.subr.bf16.mxu0 %v3729_v2 }
 0x689   : > { %3259 = vmatpush3.bf16.msra.mxu0 %v3446_v27  ;;  %v2124_v27 = vsub.s32 0, %v2123_v26 }
 0x68a   : > { %3260 = vmatprep.subr.bf16.mxu0 %v3729_v2 }
 0x68d   : > { %3261 = vmatpush3.bf16.msra.mxu0 %v3447_v28  ;;  %v2120_v28 = vld [vmem:[%s949_s0] sm:$0x3] }
 0x68e   : > { %2212 = vmatprep.subr.bf16.mxu0 %v3450_v41 }
 0x730   : > { %v1866_v29 = vpop.f32.mrf.mxu0 }
 0x731   : > { %v1872_v30 = vpack.c.bf16 %v1866_v29, %v1866_v29  ;;  %v2128_v29 = vsub.s32 1, %v2123_v26 }
 0x732   : > { %v3244_v31 = vpop.f32.mrf.mxu0 }
 0x733   : > { %3263 = vmatmul.mubr.bf16.vlgmr.msra.gmra.mxu0 %v1872_v30  ;;  %v2125_v30 = vrot.slane %v2120_v28, %v2124_v27  ;;  %v2129_v31 = vrot.slane %v2120_v28, %v2128_v29 }
 0x734   : > { %v1869_v32 = vpop.f32.mrf.mxu0  ;;  %2213 = vmatpush1.bf16.msra.mxu0 %v3448_v40  ;;  %2244 = vmatprep.mubr.bf16.mxu0 %v3731_v55 }
 0x735   : > { %2214 = vmatprep.subr.bf16.mxu0 %v3453_v43 }
 0x736   : > { %v3245_v33 = vpop.f32.mrf.mxu0 }
 0x738   : > { %2215 = vmatpush1.bf16.msra.mxu0 %v3451_v44 }
 0x739   : > { %2216 = vmatprep.subr.bf16.mxu0 %v3456_v48 }
 0x73c   : > { %2217 = vmatpush1.bf16.msra.mxu0 %v3454_v49 }
 0x73d   : > { %2218 = vmatprep.subr.bf16.mxu0 %v3459_v51 }
 0x740   : > { %2219 = vmatpush1.bf16.msra.mxu0 %v3457_v50 }
 0x741   : > { %2220 = vmatprep.subr.bf16.mxu0 %v3462_v52 }
 0x744   : > { %2221 = vmatpush1.bf16.msra.mxu0 %v3460_v53 }
 0x745   : > { %2222 = vmatprep.subr.bf16.mxu0 %v3465_v54 }
 0x748   : > { %2223 = vmatpush1.bf16.msra.mxu0 %v3463_v56 }
 0x749   : > { %2224 = vmatprep.subr.bf16.mxu0 %v3468_v57  ;;  %v2972_v57 = vld [vmem:[%s952_s12] ss:$0 sm:$0xff] }
 0x74c   : > { %2225 = vmatpush1.bf16.msra.mxu0 %v3466_v58 }
 0x74d   : > { %2226 = vmatprep.subr.bf16.mxu0 %v3471_v59 }
 0x750   : > { %2227 = vmatpush1.bf16.msra.mxu0 %v3469_v60 }
 0x7f3   : > { %v1972_v19 = vpop.f32.mrf.mxu0 }
 0x7f4   : > { %v2061_v35 = vadd.f32 %v2060_v0, %v1972_v19 }
 0x7f5   : > { %v3264_v2 = vpop.f32.mrf.mxu0 }
 0x7f6   : > { %v2073_v36 = vadd.f32 %v2953_v34, %v2061_v35 }
 0x7f7   : > { %v1975_v37 = vpop.f32.mrf.mxu0 }
 0x7f8   : > { %v2074_v38 = vadd.f32 %v2073_v36, %v4142_v17 }
 0x7f9   : > { %v3265_v39 = vpop.f32.mrf.mxu0 }
 0x7fa   : > { %2077 = vadd.xlane.f32.xlu0 %v2074_v38 }
 0x883   : > { %v2078_v45 = vpop.xlane.xlu0 %2077 }
 0x884   : > { %v2080_v46 = vmul.f32 0.0078125, %v2078_v45 }
 0x886   : > { %v2081_v17 = vsub.f32 %v2074_v38, %v2080_v46 }
 0x888   : > { %v2082_v47 = vmul.f32 %v2081_v17, %v2081_v17 }
 0x88a   : > { %2083 = vadd.xlane.f32.xlu1 %v2082_v47 }
 0x913   : > { %v2084_v61 = vpop.xlane.xlu1 %2083 }
 0x914   : > { %v2085_v62 = vmul.f32 0.0078125, %v2084_v61 }
 0x916   : > { %v2086_v63 = vadd.f32 1e-12, %v2085_v62 }
 0x918   : > { %3496 = vrsqrt.f32 %v2086_v63 }
 0x925   : > { %v3497_v0 = vpop.eup %3496 }
 0x926   : > { %v2088_v3 = vmul.f32 %v3497_v0, %v2081_v17 }
 0x928   : > { %v2095_v5 = vmul.f32 %v2954_v1, %v2088_v3 }
 0x92a   : > { %v4332_v6 = vadd.f32 %v2955_v4, %v2095_v5 }
 0x92c   : > { %v2103_v7 = vpack.c.bf16 %v4332_v6, %v4332_v6 }
 0x92e   : > { %2245 = vmatmul.mubr.bf16.vlgmr.msra.gmra.mxu0 %v2103_v7 }
 0x9ee   : > { %v2246_v32 = vpop.f32.mrf.mxu0 }
 0x9ef   : > { %v2247_v33 = vadd.f32 %v2246_v32, %v2125_v30 }
 0x9f0   : > { %v2248_v19 = vpop.f32.mrf.mxu0 }
 0x9f1   : > { %v2255_v34 = vmul.f32 0.044715, %v2247_v33  ;;  %v2249_v35 = vadd.f32 %v2248_v19, %v2129_v31  ;;  %v2253_v49 = vmul.f32 0.5, %v2247_v33 }
 0x9f2   : > { %v2250_v2 = vpop.f32.mrf.mxu0 }
 0x9f3   : > { %v2257_v36 = vmul.f32 %v2255_v34, %v2247_v33  ;;  %v2256_v37 = vmul.f32 0.044715, %v2249_v35  ;;  %v2254_v50 = vmul.f32 0.5, %v2249_v35 }
 0x9f4   : > { %v2251_v38 = vpop.f32.mrf.mxu0 }
 0x9f5   : > { %v2259_v39 = vmul.f32 %v2257_v36, %v2247_v33  ;;  %v2258_v40 = vmul.f32 %v2256_v37, %v2249_v35 }
 0x9f7   : > { %v2261_v41 = vadd.f32 %v2259_v39, %v2247_v33  ;;  %v2260_v43 = vmul.f32 %v2258_v40, %v2249_v35 }
 0x9f9   : > { %v2263_v44 = vmul.f32 0.7978846, %v2261_v41  ;;  %v2262_v45 = vadd.f32 %v2260_v43, %v2249_v35 }
 0x9fb   : > { %v2264_v46 = vmul.f32 0.7978846, %v2262_v45  ;;  %3498 = vtanh.f32 %v2263_v44 }
 0x9fd   : > { %3500 = vtanh.f32 %v2264_v46 }
 0xa08   : > { %v3499_v17 = vpop.eup %3498 }
 0xa09   : > { %v2267_v47 = vadd.f32 1.0, %v3499_v17 }
 0xa0a   : > { %v3501_v48 = vpop.eup %3500 }
 0xa0b   : > { %v2268_v51 = vadd.f32 1.0, %v3501_v48  ;;  %v2269_v52 = vmul.f32 %v2267_v47, %v2253_v49 }
 0xa0d   : > { %v2270_v53 = vmul.f32 %v2268_v51, %v2254_v50  ;;  %v2271_v55 = vpack.c.bf16 %v2269_v52, %v2269_v52 }
 0xa0f   : > { %v2272_v54 = vpack.c.bf16 %v2270_v53, %v2270_v53 }
 0xa11   : > { %2440 = vmatprep.mubr.bf16.mxu1 %v2272_v54 }
 0xa12   : > { %2441 = vmatmul.mubr.bf16.vlgmr.msra.gmra.mxu1 %v2271_v55 }
 0xad2   : > { %v3096_v56 = vpop.f32.mrf.mxu1 }
 0xad4   : > { %v3097_v58 = vpop.f32.mrf.mxu1 }
 0xad5   : > { %v3098_v59 = vadd.f32 %v3097_v58, %v3096_v56 }
 0xad6   : > { %v3099_v60 = vpop.f32.mrf.mxu1 }
 0xad7   : > { %v2443_v61 = vadd.f32 %v3098_v59, %v2972_v57 }
 0xad8   : > { %v3100_v62 = vpop.f32.mrf.mxu1 }
 0xad9   : > { %v2448_v63 = vadd.f32 %v2443_v61, %v4332_v6  ;;  %v2990_v6 = vld [vmem:[%s958_s29] ss:$0 sm:$0xff] }
 0xadb   : > { %2451 = vadd.xlane.f32.xlu0 %v2448_v63 }
 0xb64   : > { %v2452_v0 = vpop.xlane.xlu0 %2451 }
 0xb65   : > { %v2453_v1 = vmul.f32 0.0078125, %v2452_v0 }
 0xb67   : > { %v2454_v3 = vsub.f32 %v2448_v63, %v2453_v1 }
 0xb69   : > { %v2455_v4 = vmul.f32 %v2454_v3, %v2454_v3 }
 0xb6b   : > { %2456 = vadd.xlane.f32.xlu1 %v2455_v4 }
 0xbf4   : > { %v2457_v5 = vpop.xlane.xlu1 %2456 }
 0xbf5   : > { %v2458_v7 = vmul.f32 0.0078125, %v2457_v5 }
 0xbf7   : > { %v2459_v8 = vadd.f32 1e-12, %v2458_v7 }
 0xbf9   : > { %3502 = vrsqrt.f32 %v2459_v8 }
 0xc06   : > { %v3503_v9 = vpop.eup %3502 }
 0xc07   : > { %v2461_v11 = vmul.f32 %v3503_v9, %v2454_v3 }
 0xc09   : > { %v2468_v12 = vmul.f32 %v2989_v10, %v2461_v11  ;;  %2480 = sbr.rel (%p2991_p7) target bundleno = 3087 (0xc0f), region = 120 }
 0xc0b   : > { %v2475_v13 = vadd.f32 %v2990_v6, %v2468_v12 }
 0xc0d   : > { %2476 = vst [vmem:[#allocation2] sm:$0xff] %v2475_v13 }
 0xc0e   : > { %2481 = vst [vmem:[%s4103_s1] sm:$0xff] %v2475_v13 }
 0xc0f PF: > { %s4519_s5 = sld [smem:[#allocation19_spill]] }
 0xc10   : > { %s4520_s27 = sld [smem:[#allocation14_spill]] }
 0xc11   : > { %s4521_s28 = sld [smem:[#allocation15_spill]] }
 0xc12   : > { %s4522_s29 = sld [smem:[#allocation22_spill]] }
 0xc13   : > { %s4523_s30 = sld [smem:[#allocation17_spill]] }
 0xc14   : > { %s4524_s0 = sld [smem:[#allocation18_spill]] }
 0xc15   : > { %s37_s20 = sadd.s32 1, %s4519_s5   ;;  %s4525_s19 = sld [smem:[#allocation20_spill]] }
 0xc16   : > { %p34_p5 = scmp.ge.s32.totalorder %s37_s20, 6   ;;  %s4526_s1 = sld [smem:[#allocation21_spill]] }
 0xc18   :  { %36 = sbr.rel (!%p34_p5) target bundleno = 29 (0x1d), region = 234 }
 0xc1d   :  { %2501 = vsyncpa [#allocation4], 1 }
 0xc1e   :  { %2503 = vsyncpa [#allocation4 + $0x1], 1 }
 0xc1f   :  { %2504 = vsyncpa [#allocation6], 1 }
 0xc20   :  { %2506 = vsyncpa [#allocation6 + $0x1], 1 }
 0xc21   :  { %2507 = vsyncpa [#allocation9], 1 }
 0xc22   :  { %2509 = vsyncpa [#allocation9 + $0x1], 1 }

</bundles_post_ra>
